<compile_context>
chip_gen: v6e
topology: v6e:2x2x1
jax: 0.10.0
libtpu: 0.0.40
codegen_flags: <defaults>
</compile_context>

<pallas_src>
import jax
import jax.numpy as jnp
import numpy as np
from jax.experimental import pallas as pl
from jax.experimental.pallas import tpu as pltpu

LEAKY_SLOPE = 0.01   # nn.LeakyReLU default
LN_EPS = 1e-5        # nn.LayerNorm default


def _round_up(x, m):
    return ((x + m - 1) // m) * m


# ---------------------------------------------------------------------------
# hardware caps (tiling heuristics only -- correctness never depends on them)
# ---------------------------------------------------------------------------
def _tpu_caps():
    vmem_bytes = 128 << 20          # v5e / v6e per-core default
    num_tc = 1
    try:
        info = pltpu.get_tpu_info()
        vmem_bytes = int(getattr(info, "vmem_capacity_bytes", vmem_bytes))
    except Exception:
        pass
    try:
        kind = jax.devices()[0].device_kind.lower()
        if ("v4" in kind) or ("v7" in kind):      # megacore: 2 TC / chip
            num_tc = 2
    except Exception:
        pass
    if vmem_bytes <= (64 << 20):                  # 64 MiB/TC => v7x-class
        num_tc = max(num_tc, 2)
    return vmem_bytes, num_tc


# ---------------------------------------------------------------------------
# kernel
# ---------------------------------------------------------------------------
def _layernorm(h, gamma, beta):
    # two-pass LN: mu, then E[(h-mu)^2] -- same XLU reduce count, no
    # catastrophic cancellation (vs E[x^2]-mu^2).
    inv_f = 1.0 / h.shape[-1]
    mu = jnp.sum(h, axis=-1, keepdims=True) * inv_f
    c = h - mu
    var = jnp.sum(c * c, axis=-1, keepdims=True) * inv_f
    return c * jax.lax.rsqrt(var + LN_EPS) * gamma + beta


def _leaky_relu(h):
    return jnp.where(h >= 0, h, LEAKY_SLOPE * h)


def spectral_encoder_kernel(
    x_ref,
    w1_ref, b1_ref, g1_ref, be1_ref,
    w2_ref, b2_ref, g2_ref, be2_ref,
    w3_ref, b3_ref, g3_ref, be3_ref,
    wh_ref, bh_ref,          # fused (and 128-lane-padded) head weight / bias
    out_ref,                 # (tile_b, head_pad) lane-dense output slab
):
    w_dtype = w1_ref.dtype   # MXU operand dtype (f32 or bf16)

    x = x_ref[...]
    if x.dtype != w_dtype:   # conditional cast only when bf16 MXU path is used
        x = x.astype(w_dtype)

    # block 1
    h = jnp.dot(x, w1_ref[...], preferred_element_type=jnp.float32) + b1_ref[...]
    h = _leaky_relu(_layernorm(h, g1_ref[...], be1_ref[...]))
    skip = h

    # block 2 + residual
    h = jnp.dot(h.astype(w_dtype), w2_ref[...],
                preferred_element_type=jnp.float32) + b2_ref[...]
    h = _leaky_relu(_layernorm(h, g2_ref[...], be2_ref[...])) + skip
    skip = h

    # block 3 + residual
    h = jnp.dot(h.astype(w_dtype), w3_ref[...],
                preferred_element_type=jnp.float32) + b3_ref[...]
    h = _leaky_relu(_layernorm(h, g3_ref[...], be3_ref[...])) + skip

    # fused heads: one lane-dense matmul + one unmasked store
    out_ref[...] = (
        jnp.dot(h.astype(w_dtype), wh_ref[...],
                preferred_element_type=jnp.float32) + bh_ref[...]
    ).astype(out_ref.dtype)


# ---------------------------------------------------------------------------
# one-time parameter preprocessing (hoisted out of the forward path)
# ---------------------------------------------------------------------------
def prepare_params(params, mxu_dtype=None):
    """Fuse the mean/log_var heads into one 128-lane-padded weight/bias and
    optionally cast matmul weights to the MXU operand dtype. Call once."""
    n_bands, hidden = params["w1"].shape
    ld_half = params["wm"].shape[1]
    ld = params["wv"].shape[1]
    head_dim = ld_half + ld
    head_pad = _round_up(head_dim, 128)       # lane-dense output slab

    w_head = jnp.concatenate([params["wm"], params["wv"]], axis=1)
    b_head = jnp.concatenate([params["bm"], params["bv"]], axis=1)
    if head_pad != head_dim:
        w_head = jnp.pad(w_head, ((0, 0), (0, head_pad - head_dim)))
        b_head = jnp.pad(b_head, ((0, 0), (0, head_pad - head_dim)))

    w1, w2, w3 = params["w1"], params["w2"], params["w3"]
    if mxu_dtype is not None:
        w1, w2, w3, w_head = (a.astype(mxu_dtype) for a in (w1, w2, w3, w_head))

    arrays = (
        w1, params["b1"], params["g1"], params["be1"],
        w2, params["b2"], params["g2"], params["be2"],
        w3, params["b3"], params["g3"], params["be3"],
        w_head, b_head,
    )
    return dict(arrays=arrays, n_bands=int(n_bands), hidden=int(hidden),
                ld_half=int(ld_half), ld=int(ld),
                head_dim=int(head_dim), head_pad=int(head_pad))


# ---------------------------------------------------------------------------
# tiling / VMEM heuristics
# ---------------------------------------------------------------------------
def _auto_tile_b(B, n_bands, hidden, head_pad, param_bytes, vmem_cap, num_tc):
    b8 = _round_up(B, 8)
    # per-row VMEM: double-buffered input + output slabs + f32 activation headroom
    row_bytes = 4 * (2 * n_bands + 2 * head_pad + 8 * hidden)
    budget = max(vmem_cap - param_bytes - (4 << 20), 1 << 20)
    cap = int(min(max(budget // row_bytes, 8), 2048))

    if b8 <= cap:
        if num_tc > 1 and b8 > 256:
            # split only across the real cores (even grid on megacore chips)
            return int(_round_up(pl.cdiv(b8, num_tc), 8))
        return int(b8)            # single-step whole batch on 1-TC chips

    # many-step case: MXU-aligned tile, step count a multiple of the TC count
    align = 256 if cap >= 256 else 8
    tile = max((cap // align) * align, align)
    if num_tc > 1:
        steps = int(_round_up(pl.cdiv(b8, tile), num_tc))
        tile = int(_round_up(pl.cdiv(b8, steps), 8))   # rebalance evenly
    return int(tile)


def _vmem_limit(tile_b, n_bands, hidden, head_pad, param_bytes,
                out_itemsize, vmem_cap):
    io_bytes = 2 * tile_b * (4 * n_bands + out_itemsize * head_pad)
    act_bytes = 8 * tile_b * hidden * 4
    need = 2 * param_bytes + io_bytes + act_bytes + (4 << 20)
    return int(min(max(need, 16 << 20), vmem_cap))


# ---------------------------------------------------------------------------
# wrapper
# ---------------------------------------------------------------------------
def spectral_encoder(x, params=None, *, prepared=None, tile_b=None,
                     mxu_dtype=None, out_dtype=jnp.float32):
    """x: (B, n_bands) float32 -> (mean (B, ld//2), log_var (B, ld)).

    Pass `prepared=prepare_params(params, mxu_dtype)` to hoist the one-time
    head-fusion / lane-pad / weight-cast work out of the forward path.
    mxu_dtype (e.g. jnp.bfloat16) only affects matmul operands; LayerNorm /
    LeakyReLU / bias math stays float32 (activations are rounded to bf16 at
    each matmul input in that mode). out_dtype=jnp.bfloat16 halves output-slab
    HBM traffic if the consumer tolerates it.
    """
    if prepared is None:
        if params is None:
            raise ValueError("need `params` or `prepared`")
        prepared = prepare_params(params, mxu_dtype=mxu_dtype)

    B, n_bands = x.shape
    assert n_bands == prepared["n_bands"]
    hidden = prepared["hidden"]
    head_pad = prepared["head_pad"]
    head_dim = prepared["head_dim"]
    ld_half = prepared["ld_half"]
    param_arrays = prepared["arrays"]
    param_bytes = sum(a.size * a.dtype.itemsize for a in param_arrays)

    vmem_phys, num_tc = _tpu_caps()
    # ~12 MiB headroom below physical VMEM (Mosaic scratch, semaphores,
    # pipeline windows); v5e/v6e allowed up to ~100 MiB, v7x lands ~52 MiB.
    vmem_cap = int(max(min(vmem_phys - (12 << 20), 100 << 20), 16 << 20))

    if tile_b is None:
        tile_b = _auto_tile_b(B, n_bands, hidden, head_pad, param_bytes,
                              vmem_cap, num_tc)
    grid = int(pl.cdiv(B, tile_b))   # partial final block handles ragged B

    out_itemsize = jnp.dtype(out_dtype).itemsize
    vmem_limit = _vmem_limit(tile_b, n_bands, hidden, head_pad, param_bytes,
                             out_itemsize, vmem_cap)
    out_shape = jax.ShapeDtypeStruct((B, head_pad), out_dtype)

    def make_call(param_buffers):
        if param_buffers is None:
            def param_spec(a):
                return pl.BlockSpec(a.shape, lambda i: (0, 0))
        else:
            def param_spec(a):
                return pl.BlockSpec(a.shape, lambda i: (0, 0),
                                    pipeline_mode=pl.Buffered(param_buffers))
        grid_spec = pltpu.PrefetchScalarGridSpec(
            num_scalar_prefetch=0,
            grid=(grid,),
            in_specs=[pl.BlockSpec((tile_b, n_bands), lambda i: (i, 0))]
            + [param_spec(a) for a in param_arrays],
            out_specs=pl.BlockSpec((tile_b, head_pad), lambda i: (i, 0)),
        )
        return pl.pallas_call(
            spectral_encoder_kernel,
            out_shape=out_shape,
            grid_spec=grid_spec,
            compiler_params=pltpu.CompilerParams(
                dimension_semantics=("parallel",),
                vmem_limit_bytes=vmem_limit,
            ),
        )

    # Grid-invariant params want a single VMEM buffer (pl.Buffered(1)); fall
    # back to the default double-buffered pipeline if this build rejects it.
    try:
        out = make_call(1)(x, *param_arrays)
    except Exception:
        out = make_call(None)(x, *param_arrays)

    # TODO(synk): fuse this slice into the consumer jit (or read the padded
    # slab directly) to avoid one extra HBM pass over the output at large B.
    mean = out[:, :ld_half]
    log_var = out[:, ld_half:head_dim]
    return mean, log_var


# ---------------------------------------------------------------------------
# synthetic params + pure-JAX reference
# ---------------------------------------------------------------------------
def init_params(key, n_bands, ld, hidden_dim):
    """Deterministic synthetic init matching nn.Linear / nn.LayerNorm shapes.
    Linear weights stored as (in_features, out_features)."""
    ks = jax.random.split(key, 10)

    def linear(kw, kb, fan_in, fan_out):
        bound = 1.0 / np.sqrt(fan_in)
        w = jax.random.uniform(kw, (fan_in, fan_out), jnp.float32, -bound, bound)
        b = jax.random.uniform(kb, (1, fan_out), jnp.float32, -bound, bound)
        return w, b

    w1, b1 = linear(ks[0], ks[1], n_bands, hidden_dim)
    w2, b2 = linear(ks[2], ks[3], hidden_dim, hidden_dim)
    w3, b3 = linear(ks[4], ks[5], hidden_dim, hidden_dim)
    wm, bm = linear(ks[6], ks[7], hidden_dim, ld // 2)
    wv, bv = linear(ks[8], ks[9], hidden_dim, ld)

    ones = jnp.ones((1, hidden_dim), jnp.float32)
    zeros = jnp.zeros((1, hidden_dim), jnp.float32)
    return dict(
        w1=w1, b1=b1, g1=ones, be1=zeros,
        w2=w2, b2=b2, g2=ones, be2=zeros,
        w3=w3, b3=b3, g3=ones, be3=zeros,
        wm=wm, bm=bm, wv=wv, bv=bv,
    )


def reference_forward(x, p):
    """Pure-JAX reference of SpectralEncoder.forward for validation."""
    def block(h, w, b, g, be):
        h = h @ w + b
        mu = h.mean(-1, keepdims=True)
        var = ((h - mu) ** 2).mean(-1, keepdims=True)
        h = (h - mu) / jnp.sqrt(var + LN_EPS) * g + be
        return jnp.where(h >= 0, h, LEAKY_SLOPE * h)

    h = block(x, p["w1"], p["b1"], p["g1"], p["be1"])
    h = block(h, p["w2"], p["b2"], p["g2"], p["be2"]) + h
    h = block(h, p["w3"], p["b3"], p["g3"], p["be3"]) + h
    return h @ p["wm"] + p["bm"], h @ p["wv"] + p["bv"]


if __name__ == "__main__":
    n_bands, ld, hidden_dim = 16, 8, 32
    batch = 16

    key = jax.random.PRNGKey(0)
    k_x, k_p = jax.random.split(key)
    x = jax.random.normal(k_x, (batch, n_bands), jnp.float32)
    params = init_params(k_p, n_bands, ld, hidden_dim)
    ref_mean, ref_log_var = reference_forward(x, params)

    # 1) f32 path with params prepared once (hoisted preprocessing)
    prep = prepare_params(params)
    mean, log_var = spectral_encoder(x, prepared=prep)
    jax.block_until_ready((mean, log_var))
    np.testing.assert_allclose(np.asarray(mean), np.asarray(ref_mean),
                               rtol=1e-4, atol=1e-4)
    np.testing.assert_allclose(np.asarray(log_var), np.asarray(ref_log_var),
                               rtol=1e-4, atol=1e-4)
    assert mean.shape == (batch, ld // 2) and log_var.shape == (batch, ld)

    # 2) ragged batch: partial final block, no wrapper-side padding copy
    mean_r, log_var_r = spectral_encoder(x[:13], prepared=prep)
    jax.block_until_ready((mean_r, log_var_r))
    np.testing.assert_allclose(np.asarray(mean_r), np.asarray(ref_mean)[:13],
                               rtol=1e-4, atol=1e-4)
    np.testing.assert_allclose(np.asarray(log_var_r),
                               np.asarray(ref_log_var)[:13],
                               rtol=1e-4, atol=1e-4)

    # 3) forced multi-step grid (exercises Buffered(1) param residency)
    mean_t, log_var_t = spectral_encoder(x, params, tile_b=8)
    jax.block_until_ready((mean_t, log_var_t))
    np.testing.assert_allclose(np.asarray(mean_t), np.asarray(ref_mean),
                               rtol=1e-4, atol=1e-4)
    np.testing.assert_allclose(np.asarray(log_var_t), np.asarray(ref_log_var),
                               rtol=1e-4, atol=1e-4)

    # 4) bf16-MXU path (weights rounded to bf16; activations also rounded to
    #    bf16 at matmul inputs -- validated deliberately at 5e-2 tolerance
    #    against a bf16-weight reference)
    prep_b = prepare_params(params, mxu_dtype=jnp.bfloat16)
    mean_b, log_var_b = spectral_encoder(x, prepared=prep_b)
    jax.block_until_ready((mean_b, log_var_b))
    p_b = dict(params)
    for k in ("w1", "w2", "w3", "wm", "wv"):
        p_b[k] = params[k].astype(jnp.bfloat16).astype(jnp.float32)
    ref_mean_b, ref_log_var_b = reference_forward(x, p_b)
    np.testing.assert_allclose(np.asarray(mean_b), np.asarray(ref_mean_b),
                               rtol=5e-2, atol=5e-2)
    np.testing.assert_allclose(np.asarray(log_var_b), np.asarray(ref_log_var_b),
                               rtol=5e-2, atol=5e-2)

    print("KERNEL_OK")
</pallas_src>

<mosaic_0001>
module attributes {stable_mosaic.version = 11 : i64} {
  func.func @spectral_encoder_kernel(%arg0: i32, %arg1: memref<16x16xf32, #tpu.memory_space<vmem>>, %arg2: memref<16x32xf32, #tpu.memory_space<vmem>>, %arg3: memref<1x32xf32, #tpu.memory_space<vmem>>, %arg4: memref<1x32xf32, #tpu.memory_space<vmem>>, %arg5: memref<1x32xf32, #tpu.memory_space<vmem>>, %arg6: memref<32x32xf32, #tpu.memory_space<vmem>>, %arg7: memref<1x32xf32, #tpu.memory_space<vmem>>, %arg8: memref<1x32xf32, #tpu.memory_space<vmem>>, %arg9: memref<1x32xf32, #tpu.memory_space<vmem>>, %arg10: memref<32x32xf32, #tpu.memory_space<vmem>>, %arg11: memref<1x32xf32, #tpu.memory_space<vmem>>, %arg12: memref<1x32xf32, #tpu.memory_space<vmem>>, %arg13: memref<1x32xf32, #tpu.memory_space<vmem>>, %arg14: memref<32x128xf32, #tpu.memory_space<vmem>>, %arg15: memref<1x128xf32, #tpu.memory_space<vmem>>, %arg16: memref<16x128xf32, #tpu.memory_space<vmem>>) attributes {dimension_semantics = [#tpu.dimension_semantics<parallel>], iteration_bounds = array<i64: 1>, scalar_prefetch = 0 : i64, scratch_operands = 0 : i64, tpu.core_type = #tpu.core_type<tc>, window_params = [{transform_indices = @transform_0, window_bounds = array<i64: 16, 16>}, {pipeline_mode = #tpu.pipeline_mode<synchronous>, transform_indices = @transform_1, window_bounds = array<i64: 16, 32>}, {pipeline_mode = #tpu.pipeline_mode<synchronous>, transform_indices = @transform_2, window_bounds = array<i64: 1, 32>}, {pipeline_mode = #tpu.pipeline_mode<synchronous>, transform_indices = @transform_3, window_bounds = array<i64: 1, 32>}, {pipeline_mode = #tpu.pipeline_mode<synchronous>, transform_indices = @transform_4, window_bounds = array<i64: 1, 32>}, {pipeline_mode = #tpu.pipeline_mode<synchronous>, transform_indices = @transform_5, window_bounds = array<i64: 32, 32>}, {pipeline_mode = #tpu.pipeline_mode<synchronous>, transform_indices = @transform_6, window_bounds = array<i64: 1, 32>}, {pipeline_mode = #tpu.pipeline_mode<synchronous>, transform_indices = @transform_7, window_bounds = array<i64: 1, 32>}, {pipeline_mode = #tpu.pipeline_mode<synchronous>, transform_indices = @transform_8, window_bounds = array<i64: 1, 32>}, {pipeline_mode = #tpu.pipeline_mode<synchronous>, transform_indices = @transform_9, window_bounds = array<i64: 32, 32>}, {pipeline_mode = #tpu.pipeline_mode<synchronous>, transform_indices = @transform_10, window_bounds = array<i64: 1, 32>}, {pipeline_mode = #tpu.pipeline_mode<synchronous>, transform_indices = @transform_11, window_bounds = array<i64: 1, 32>}, {pipeline_mode = #tpu.pipeline_mode<synchronous>, transform_indices = @transform_12, window_bounds = array<i64: 1, 32>}, {pipeline_mode = #tpu.pipeline_mode<synchronous>, transform_indices = @transform_13, window_bounds = array<i64: 32, 128>}, {pipeline_mode = #tpu.pipeline_mode<synchronous>, transform_indices = @transform_14, window_bounds = array<i64: 1, 128>}, {transform_indices = @transform_15, window_bounds = array<i64: 16, 128>}]} {
    %c0 = arith.constant 0 : index
    %c0_0 = arith.constant 0 : index
    %0 = vector.load %arg1[%c0, %c0_0] : memref<16x16xf32, #tpu.memory_space<vmem>>, vector<16x16xf32>
    %c0_1 = arith.constant 0 : index
    %c0_2 = arith.constant 0 : index
    %1 = vector.load %arg2[%c0_1, %c0_2] : memref<16x32xf32, #tpu.memory_space<vmem>>, vector<16x32xf32>
    %cst = arith.constant dense<0.000000e+00> : vector<16x32xf32>
    %2 = tpu.matmul %0, %1, %cst {dimension_numbers = #tpu.dot_dimension_numbers<[1], [0], [0], [1], [0, 0, 1, 1], [], []>} : vector<16x16xf32>, vector<16x32xf32>, vector<16x32xf32> -> vector<16x32xf32>
    %c0_3 = arith.constant 0 : index
    %c0_4 = arith.constant 0 : index
    %3 = vector.load %arg3[%c0_3, %c0_4] : memref<1x32xf32, #tpu.memory_space<vmem>>, vector<1x32xf32>
    %4 = vector.broadcast %3 : vector<1x32xf32> to vector<16x32xf32>
    %5 = arith.addf %2, %4 : vector<16x32xf32>
    %c0_5 = arith.constant 0 : index
    %c0_6 = arith.constant 0 : index
    %6 = vector.load %arg4[%c0_5, %c0_6] : memref<1x32xf32, #tpu.memory_space<vmem>>, vector<1x32xf32>
    %c0_7 = arith.constant 0 : index
    %c0_8 = arith.constant 0 : index
    %7 = vector.load %arg5[%c0_7, %c0_8] : memref<1x32xf32, #tpu.memory_space<vmem>>, vector<1x32xf32>
    %cst_9 = arith.constant dense<0.000000e+00> : vector<16xf32>
    %8 = vector.multi_reduction <add>, %5, %cst_9 [1] : vector<16x32xf32> to vector<16xf32>
    %9 = vector.shape_cast %8 : vector<16xf32> to vector<16x1xf32>
    %cst_10 = arith.constant 3.125000e-02 : f32
    %10 = vector.broadcast %cst_10 : f32 to vector<16x1xf32>
    %11 = arith.mulf %9, %10 : vector<16x1xf32>
    %12 = vector.broadcast %11 : vector<16x1xf32> to vector<16x32xf32>
    %13 = arith.subf %5, %12 : vector<16x32xf32>
    %14 = arith.mulf %13, %13 : vector<16x32xf32>
    %cst_11 = arith.constant dense<0.000000e+00> : vector<16xf32>
    %15 = vector.multi_reduction <add>, %14, %cst_11 [1] : vector<16x32xf32> to vector<16xf32>
    %16 = vector.shape_cast %15 : vector<16xf32> to vector<16x1xf32>
    %cst_12 = arith.constant 3.125000e-02 : f32
    %17 = vector.broadcast %cst_12 : f32 to vector<16x1xf32>
    %18 = arith.mulf %16, %17 : vector<16x1xf32>
    %cst_13 = arith.constant 9.99999974E-6 : f32
    %19 = vector.broadcast %cst_13 : f32 to vector<16x1xf32>
    %20 = arith.addf %18, %19 : vector<16x1xf32>
    %21 = math.rsqrt %20 : vector<16x1xf32>
    %22 = vector.broadcast %21 : vector<16x1xf32> to vector<16x32xf32>
    %23 = arith.mulf %13, %22 : vector<16x32xf32>
    %24 = vector.broadcast %6 : vector<1x32xf32> to vector<16x32xf32>
    %25 = arith.mulf %23, %24 : vector<16x32xf32>
    %26 = vector.broadcast %7 : vector<1x32xf32> to vector<16x32xf32>
    %27 = arith.addf %25, %26 : vector<16x32xf32>
    %cst_14 = arith.constant 0.000000e+00 : f32
    %28 = vector.broadcast %cst_14 : f32 to vector<16x32xf32>
    %29 = arith.cmpf oge, %27, %28 : vector<16x32xf32>
    %cst_15 = arith.constant 0.00999999977 : f32
    %30 = vector.broadcast %cst_15 : f32 to vector<16x32xf32>
    %31 = arith.mulf %30, %27 : vector<16x32xf32>
    %32 = arith.select %29, %27, %31 : vector<16x32xi1>, vector<16x32xf32>
    %c0_16 = arith.constant 0 : index
    %c0_17 = arith.constant 0 : index
    %33 = vector.load %arg6[%c0_16, %c0_17] : memref<32x32xf32, #tpu.memory_space<vmem>>, vector<32x32xf32>
    %cst_18 = arith.constant dense<0.000000e+00> : vector<16x32xf32>
    %34 = tpu.matmul %32, %33, %cst_18 {dimension_numbers = #tpu.dot_dimension_numbers<[1], [0], [0], [1], [0, 0, 1, 1], [], []>} : vector<16x32xf32>, vector<32x32xf32>, vector<16x32xf32> -> vector<16x32xf32>
    %c0_19 = arith.constant 0 : index
    %c0_20 = arith.constant 0 : index
    %35 = vector.load %arg7[%c0_19, %c0_20] : memref<1x32xf32, #tpu.memory_space<vmem>>, vector<1x32xf32>
    %36 = vector.broadcast %35 : vector<1x32xf32> to vector<16x32xf32>
    %37 = arith.addf %34, %36 : vector<16x32xf32>
    %c0_21 = arith.constant 0 : index
    %c0_22 = arith.constant 0 : index
    %38 = vector.load %arg8[%c0_21, %c0_22] : memref<1x32xf32, #tpu.memory_space<vmem>>, vector<1x32xf32>
    %c0_23 = arith.constant 0 : index
    %c0_24 = arith.constant 0 : index
    %39 = vector.load %arg9[%c0_23, %c0_24] : memref<1x32xf32, #tpu.memory_space<vmem>>, vector<1x32xf32>
    %cst_25 = arith.constant dense<0.000000e+00> : vector<16xf32>
    %40 = vector.multi_reduction <add>, %37, %cst_25 [1] : vector<16x32xf32> to vector<16xf32>
    %41 = vector.shape_cast %40 : vector<16xf32> to vector<16x1xf32>
    %cst_26 = arith.constant 3.125000e-02 : f32
    %42 = vector.broadcast %cst_26 : f32 to vector<16x1xf32>
    %43 = arith.mulf %41, %42 : vector<16x1xf32>
    %44 = vector.broadcast %43 : vector<16x1xf32> to vector<16x32xf32>
    %45 = arith.subf %37, %44 : vector<16x32xf32>
    %46 = arith.mulf %45, %45 : vector<16x32xf32>
    %cst_27 = arith.constant dense<0.000000e+00> : vector<16xf32>
    %47 = vector.multi_reduction <add>, %46, %cst_27 [1] : vector<16x32xf32> to vector<16xf32>
    %48 = vector.shape_cast %47 : vector<16xf32> to vector<16x1xf32>
    %cst_28 = arith.constant 3.125000e-02 : f32
    %49 = vector.broadcast %cst_28 : f32 to vector<16x1xf32>
    %50 = arith.mulf %48, %49 : vector<16x1xf32>
    %cst_29 = arith.constant 9.99999974E-6 : f32
    %51 = vector.broadcast %cst_29 : f32 to vector<16x1xf32>
    %52 = arith.addf %50, %51 : vector<16x1xf32>
    %53 = math.rsqrt %52 : vector<16x1xf32>
    %54 = vector.broadcast %53 : vector<16x1xf32> to vector<16x32xf32>
    %55 = arith.mulf %45, %54 : vector<16x32xf32>
    %56 = vector.broadcast %38 : vector<1x32xf32> to vector<16x32xf32>
    %57 = arith.mulf %55, %56 : vector<16x32xf32>
    %58 = vector.broadcast %39 : vector<1x32xf32> to vector<16x32xf32>
    %59 = arith.addf %57, %58 : vector<16x32xf32>
    %cst_30 = arith.constant 0.000000e+00 : f32
    %60 = vector.broadcast %cst_30 : f32 to vector<16x32xf32>
    %61 = arith.cmpf oge, %59, %60 : vector<16x32xf32>
    %cst_31 = arith.constant 0.00999999977 : f32
    %62 = vector.broadcast %cst_31 : f32 to vector<16x32xf32>
    %63 = arith.mulf %62, %59 : vector<16x32xf32>
    %64 = arith.select %61, %59, %63 : vector<16x32xi1>, vector<16x32xf32>
    %65 = arith.addf %64, %32 : vector<16x32xf32>
    %c0_32 = arith.constant 0 : index
    %c0_33 = arith.constant 0 : index
    %66 = vector.load %arg10[%c0_32, %c0_33] : memref<32x32xf32, #tpu.memory_space<vmem>>, vector<32x32xf32>
    %cst_34 = arith.constant dense<0.000000e+00> : vector<16x32xf32>
    %67 = tpu.matmul %65, %66, %cst_34 {dimension_numbers = #tpu.dot_dimension_numbers<[1], [0], [0], [1], [0, 0, 1, 1], [], []>} : vector<16x32xf32>, vector<32x32xf32>, vector<16x32xf32> -> vector<16x32xf32>
    %c0_35 = arith.constant 0 : index
    %c0_36 = arith.constant 0 : index
    %68 = vector.load %arg11[%c0_35, %c0_36] : memref<1x32xf32, #tpu.memory_space<vmem>>, vector<1x32xf32>
    %69 = vector.broadcast %68 : vector<1x32xf32> to vector<16x32xf32>
    %70 = arith.addf %67, %69 : vector<16x32xf32>
    %c0_37 = arith.constant 0 : index
    %c0_38 = arith.constant 0 : index
    %71 = vector.load %arg12[%c0_37, %c0_38] : memref<1x32xf32, #tpu.memory_space<vmem>>, vector<1x32xf32>
    %c0_39 = arith.constant 0 : index
    %c0_40 = arith.constant 0 : index
    %72 = vector.load %arg13[%c0_39, %c0_40] : memref<1x32xf32, #tpu.memory_space<vmem>>, vector<1x32xf32>
    %cst_41 = arith.constant dense<0.000000e+00> : vector<16xf32>
    %73 = vector.multi_reduction <add>, %70, %cst_41 [1] : vector<16x32xf32> to vector<16xf32>
    %74 = vector.shape_cast %73 : vector<16xf32> to vector<16x1xf32>
    %cst_42 = arith.constant 3.125000e-02 : f32
    %75 = vector.broadcast %cst_42 : f32 to vector<16x1xf32>
    %76 = arith.mulf %74, %75 : vector<16x1xf32>
    %77 = vector.broadcast %76 : vector<16x1xf32> to vector<16x32xf32>
    %78 = arith.subf %70, %77 : vector<16x32xf32>
    %79 = arith.mulf %78, %78 : vector<16x32xf32>
    %cst_43 = arith.constant dense<0.000000e+00> : vector<16xf32>
    %80 = vector.multi_reduction <add>, %79, %cst_43 [1] : vector<16x32xf32> to vector<16xf32>
    %81 = vector.shape_cast %80 : vector<16xf32> to vector<16x1xf32>
    %cst_44 = arith.constant 3.125000e-02 : f32
    %82 = vector.broadcast %cst_44 : f32 to vector<16x1xf32>
    %83 = arith.mulf %81, %82 : vector<16x1xf32>
    %cst_45 = arith.constant 9.99999974E-6 : f32
    %84 = vector.broadcast %cst_45 : f32 to vector<16x1xf32>
    %85 = arith.addf %83, %84 : vector<16x1xf32>
    %86 = math.rsqrt %85 : vector<16x1xf32>
    %87 = vector.broadcast %86 : vector<16x1xf32> to vector<16x32xf32>
    %88 = arith.mulf %78, %87 : vector<16x32xf32>
    %89 = vector.broadcast %71 : vector<1x32xf32> to vector<16x32xf32>
    %90 = arith.mulf %88, %89 : vector<16x32xf32>
    %91 = vector.broadcast %72 : vector<1x32xf32> to vector<16x32xf32>
    %92 = arith.addf %90, %91 : vector<16x32xf32>
    %cst_46 = arith.constant 0.000000e+00 : f32
    %93 = vector.broadcast %cst_46 : f32 to vector<16x32xf32>
    %94 = arith.cmpf oge, %92, %93 : vector<16x32xf32>
    %cst_47 = arith.constant 0.00999999977 : f32
    %95 = vector.broadcast %cst_47 : f32 to vector<16x32xf32>
    %96 = arith.mulf %95, %92 : vector<16x32xf32>
    %97 = arith.select %94, %92, %96 : vector<16x32xi1>, vector<16x32xf32>
    %98 = arith.addf %97, %65 : vector<16x32xf32>
    %c0_48 = arith.constant 0 : index
    %c0_49 = arith.constant 0 : index
    %99 = vector.load %arg14[%c0_48, %c0_49] : memref<32x128xf32, #tpu.memory_space<vmem>>, vector<32x128xf32>
    %cst_50 = arith.constant dense<0.000000e+00> : vector<16x128xf32>
    %100 = tpu.matmul %98, %99, %cst_50 {dimension_numbers = #tpu.dot_dimension_numbers<[1], [0], [0], [1], [0, 0, 1, 1], [], []>} : vector<16x32xf32>, vector<32x128xf32>, vector<16x128xf32> -> vector<16x128xf32>
    %c0_51 = arith.constant 0 : index
    %c0_52 = arith.constant 0 : index
    %101 = vector.load %arg15[%c0_51, %c0_52] : memref<1x128xf32, #tpu.memory_space<vmem>>, vector<1x128xf32>
    %102 = vector.broadcast %101 : vector<1x128xf32> to vector<16x128xf32>
    %103 = arith.addf %100, %102 : vector<16x128xf32>
    %c0_53 = arith.constant 0 : index
    %c0_54 = arith.constant 0 : index
    %104 = vector.load %arg16[%c0_53, %c0_54] : memref<16x128xf32, #tpu.memory_space<vmem>>, vector<16x128xf32>
    tpu.vector_store %arg16[%c0_53, %c0_54], %103 {strides = array<i32>} : memref<16x128xf32, #tpu.memory_space<vmem>>, vector<16x128xf32>,
    return
  }
  func.func @transform_0(%arg0: i32) -> (i32, i32) {
    %c0_i32 = arith.constant 0 : i32
    %c0_i32_0 = arith.constant 0 : i32
    return %arg0, %c0_i32 : i32, i32
  }
  func.func @transform_1(%arg0: i32) -> (i32, i32) {
    %c0_i32 = arith.constant 0 : i32
    %c0_i32_0 = arith.constant 0 : i32
    %c0_i32_1 = arith.constant 0 : i32
    return %c0_i32, %c0_i32_0 : i32, i32
  }
  func.func @transform_2(%arg0: i32) -> (i32, i32) {
    %c0_i32 = arith.constant 0 : i32
    %c0_i32_0 = arith.constant 0 : i32
    %c0_i32_1 = arith.constant 0 : i32
    return %c0_i32, %c0_i32_0 : i32, i32
  }
  func.func @transform_3(%arg0: i32) -> (i32, i32) {
    %c0_i32 = arith.constant 0 : i32
    %c0_i32_0 = arith.constant 0 : i32
    %c0_i32_1 = arith.constant 0 : i32
    return %c0_i32, %c0_i32_0 : i32, i32
  }
  func.func @transform_4(%arg0: i32) -> (i32, i32) {
    %c0_i32 = arith.constant 0 : i32
    %c0_i32_0 = arith.constant 0 : i32
    %c0_i32_1 = arith.constant 0 : i32
    return %c0_i32, %c0_i32_0 : i32, i32
  }
  func.func @transform_5(%arg0: i32) -> (i32, i32) {
    %c0_i32 = arith.constant 0 : i32
    %c0_i32_0 = arith.constant 0 : i32
    %c0_i32_1 = arith.constant 0 : i32
    return %c0_i32, %c0_i32_0 : i32, i32
  }
  func.func @transform_6(%arg0: i32) -> (i32, i32) {
    %c0_i32 = arith.constant 0 : i32
    %c0_i32_0 = arith.constant 0 : i32
    %c0_i32_1 = arith.constant 0 : i32
    return %c0_i32, %c0_i32_0 : i32, i32
  }
  func.func @transform_7(%arg0: i32) -> (i32, i32) {
    %c0_i32 = arith.constant 0 : i32
    %c0_i32_0 = arith.constant 0 : i32
    %c0_i32_1 = arith.constant 0 : i32
    return %c0_i32, %c0_i32_0 : i32, i32
  }
  func.func @transform_8(%arg0: i32) -> (i32, i32) {
    %c0_i32 = arith.constant 0 : i32
    %c0_i32_0 = arith.constant 0 : i32
    %c0_i32_1 = arith.constant 0 : i32
    return %c0_i32, %c0_i32_0 : i32, i32
  }
  func.func @transform_9(%arg0: i32) -> (i32, i32) {
    %c0_i32 = arith.constant 0 : i32
    %c0_i32_0 = arith.constant 0 : i32
    %c0_i32_1 = arith.constant 0 : i32
    return %c0_i32, %c0_i32_0 : i32, i32
  }
  func.func @transform_10(%arg0: i32) -> (i32, i32) {
    %c0_i32 = arith.constant 0 : i32
    %c0_i32_0 = arith.constant 0 : i32
    %c0_i32_1 = arith.constant 0 : i32
    return %c0_i32, %c0_i32_0 : i32, i32
  }
  func.func @transform_11(%arg0: i32) -> (i32, i32) {
    %c0_i32 = arith.constant 0 : i32
    %c0_i32_0 = arith.constant 0 : i32
    %c0_i32_1 = arith.constant 0 : i32
    return %c0_i32, %c0_i32_0 : i32, i32
  }
  func.func @transform_12(%arg0: i32) -> (i32, i32) {
    %c0_i32 = arith.constant 0 : i32
    %c0_i32_0 = arith.constant 0 : i32
    %c0_i32_1 = arith.constant 0 : i32
    return %c0_i32, %c0_i32_0 : i32, i32
  }
  func.func @transform_13(%arg0: i32) -> (i32, i32) {
    %c0_i32 = arith.constant 0 : i32
    %c0_i32_0 = arith.constant 0 : i32
    %c0_i32_1 = arith.constant 0 : i32
    return %c0_i32, %c0_i32_0 : i32, i32
  }
  func.func @transform_14(%arg0: i32) -> (i32, i32) {
    %c0_i32 = arith.constant 0 : i32
    %c0_i32_0 = arith.constant 0 : i32
    %c0_i32_1 = arith.constant 0 : i32
    return %c0_i32, %c0_i32_0 : i32, i32
  }
  func.func @transform_15(%arg0: i32) -> (i32, i32) {
    %c0_i32 = arith.constant 0 : i32
    %c0_i32_0 = arith.constant 0 : i32
    return %arg0, %c0_i32 : i32, i32
  }
}

module attributes {stable_mosaic.version = 11 : i64} {
  func.func @spectral_encoder_kernel(%arg0: i32, %arg1: memref<16x16xf32, #tpu.memory_space<vmem>>, %arg2: memref<16x32xf32, #tpu.memory_space<vmem>>, %arg3: memref<1x32xf32, #tpu.memory_space<vmem>>, %arg4: memref<1x32xf32, #tpu.memory_space<vmem>>, %arg5: memref<1x32xf32, #tpu.memory_space<vmem>>, %arg6: memref<32x32xf32, #tpu.memory_space<vmem>>, %arg7: memref<1x32xf32, #tpu.memory_space<vmem>>, %arg8: memref<1x32xf32, #tpu.memory_space<vmem>>, %arg9: memref<1x32xf32, #tpu.memory_space<vmem>>, %arg10: memref<32x32xf32, #tpu.memory_space<vmem>>, %arg11: memref<1x32xf32, #tpu.memory_space<vmem>>, %arg12: memref<1x32xf32, #tpu.memory_space<vmem>>, %arg13: memref<1x32xf32, #tpu.memory_space<vmem>>, %arg14: memref<32x128xf32, #tpu.memory_space<vmem>>, %arg15: memref<1x128xf32, #tpu.memory_space<vmem>>, %arg16: memref<16x128xf32, #tpu.memory_space<vmem>>) attributes {dimension_semantics = [#tpu.dimension_semantics<parallel>], iteration_bounds = array<i64: 1>, scalar_prefetch = 0 : i64, scratch_operands = 0 : i64, tpu.core_type = #tpu.core_type<tc>, window_params = [{transform_indices = @transform_0, window_bounds = array<i64: 16, 16>}, {pipeline_mode = #tpu.pipeline_mode<synchronous>, transform_indices = @transform_1, window_bounds = array<i64: 16, 32>}, {pipeline_mode = #tpu.pipeline_mode<synchronous>, transform_indices = @transform_2, window_bounds = array<i64: 1, 32>}, {pipeline_mode = #tpu.pipeline_mode<synchronous>, transform_indices = @transform_3, window_bounds = array<i64: 1, 32>}, {pipeline_mode = #tpu.pipeline_mode<synchronous>, transform_indices = @transform_4, window_bounds = array<i64: 1, 32>}, {pipeline_mode = #tpu.pipeline_mode<synchronous>, transform_indices = @transform_5, window_bounds = array<i64: 32, 32>}, {pipeline_mode = #tpu.pipeline_mode<synchronous>, transform_indices = @transform_6, window_bounds = array<i64: 1, 32>}, {pipeline_mode = #tpu.pipeline_mode<synchronous>, transform_indices = @transform_7, window_bounds = array<i64: 1, 32>}, {pipeline_mode = #tpu.pipeline_mode<synchronous>, transform_indices = @transform_8, window_bounds = array<i64: 1, 32>}, {pipeline_mode = #tpu.pipeline_mode<synchronous>, transform_indices = @transform_9, window_bounds = array<i64: 32, 32>}, {pipeline_mode = #tpu.pipeline_mode<synchronous>, transform_indices = @transform_10, window_bounds = array<i64: 1, 32>}, {pipeline_mode = #tpu.pipeline_mode<synchronous>, transform_indices = @transform_11, window_bounds = array<i64: 1, 32>}, {pipeline_mode = #tpu.pipeline_mode<synchronous>, transform_indices = @transform_12, window_bounds = array<i64: 1, 32>}, {pipeline_mode = #tpu.pipeline_mode<synchronous>, transform_indices = @transform_13, window_bounds = array<i64: 32, 128>}, {pipeline_mode = #tpu.pipeline_mode<synchronous>, transform_indices = @transform_14, window_bounds = array<i64: 1, 128>}, {transform_indices = @transform_15, window_bounds = array<i64: 16, 128>}]} {
    %c0 = arith.constant 0 : index
    %c0_0 = arith.constant 0 : index
    %0 = vector.load %arg1[%c0, %c0_0] : memref<16x16xf32, #tpu.memory_space<vmem>>, vector<16x16xf32>
    %c0_1 = arith.constant 0 : index
    %c0_2 = arith.constant 0 : index
    %1 = vector.load %arg2[%c0_1, %c0_2] : memref<16x32xf32, #tpu.memory_space<vmem>>, vector<16x32xf32>
    %cst = arith.constant dense<0.000000e+00> : vector<16x32xf32>
    %2 = tpu.matmul %0, %1, %cst {dimension_numbers = #tpu.dot_dimension_numbers<[1], [0], [0], [1], [0, 0, 1, 1], [], []>} : vector<16x16xf32>, vector<16x32xf32>, vector<16x32xf32> -> vector<16x32xf32>
    %c0_3 = arith.constant 0 : index
    %c0_4 = arith.constant 0 : index
    %3 = vector.load %arg3[%c0_3, %c0_4] : memref<1x32xf32, #tpu.memory_space<vmem>>, vector<1x32xf32>
    %4 = vector.broadcast %3 : vector<1x32xf32> to vector<16x32xf32>
    %5 = arith.addf %2, %4 : vector<16x32xf32>
    %c0_5 = arith.constant 0 : index
    %c0_6 = arith.constant 0 : index
    %6 = vector.load %arg4[%c0_5, %c0_6] : memref<1x32xf32, #tpu.memory_space<vmem>>, vector<1x32xf32>
    %c0_7 = arith.constant 0 : index
    %c0_8 = arith.constant 0 : index
    %7 = vector.load %arg5[%c0_7, %c0_8] : memref<1x32xf32, #tpu.memory_space<vmem>>, vector<1x32xf32>
    %cst_9 = arith.constant dense<0.000000e+00> : vector<16xf32>
    %8 = vector.multi_reduction <add>, %5, %cst_9 [1] : vector<16x32xf32> to vector<16xf32>
    %9 = vector.shape_cast %8 : vector<16xf32> to vector<16x1xf32>
    %cst_10 = arith.constant 3.125000e-02 : f32
    %10 = vector.broadcast %cst_10 : f32 to vector<16x1xf32>
    %11 = arith.mulf %9, %10 : vector<16x1xf32>
    %12 = vector.broadcast %11 : vector<16x1xf32> to vector<16x32xf32>
    %13 = arith.subf %5, %12 : vector<16x32xf32>
    %14 = arith.mulf %13, %13 : vector<16x32xf32>
    %cst_11 = arith.constant dense<0.000000e+00> : vector<16xf32>
    %15 = vector.multi_reduction <add>, %14, %cst_11 [1] : vector<16x32xf32> to vector<16xf32>
    %16 = vector.shape_cast %15 : vector<16xf32> to vector<16x1xf32>
    %cst_12 = arith.constant 3.125000e-02 : f32
    %17 = vector.broadcast %cst_12 : f32 to vector<16x1xf32>
    %18 = arith.mulf %16, %17 : vector<16x1xf32>
    %cst_13 = arith.constant 9.99999974E-6 : f32
    %19 = vector.broadcast %cst_13 : f32 to vector<16x1xf32>
    %20 = arith.addf %18, %19 : vector<16x1xf32>
    %21 = math.rsqrt %20 : vector<16x1xf32>
    %22 = vector.broadcast %21 : vector<16x1xf32> to vector<16x32xf32>
    %23 = arith.mulf %13, %22 : vector<16x32xf32>
    %24 = vector.broadcast %6 : vector<1x32xf32> to vector<16x32xf32>
    %25 = arith.mulf %23, %24 : vector<16x32xf32>
    %26 = vector.broadcast %7 : vector<1x32xf32> to vector<16x32xf32>
    %27 = arith.addf %25, %26 : vector<16x32xf32>
    %cst_14 = arith.constant 0.000000e+00 : f32
    %28 = vector.broadcast %cst_14 : f32 to vector<16x32xf32>
    %29 = arith.cmpf oge, %27, %28 : vector<16x32xf32>
    %cst_15 = arith.constant 0.00999999977 : f32
    %30 = vector.broadcast %cst_15 : f32 to vector<16x32xf32>
    %31 = arith.mulf %30, %27 : vector<16x32xf32>
    %32 = arith.select %29, %27, %31 : vector<16x32xi1>, vector<16x32xf32>
    %c0_16 = arith.constant 0 : index
    %c0_17 = arith.constant 0 : index
    %33 = vector.load %arg6[%c0_16, %c0_17] : memref<32x32xf32, #tpu.memory_space<vmem>>, vector<32x32xf32>
    %cst_18 = arith.constant dense<0.000000e+00> : vector<16x32xf32>
    %34 = tpu.matmul %32, %33, %cst_18 {dimension_numbers = #tpu.dot_dimension_numbers<[1], [0], [0], [1], [0, 0, 1, 1], [], []>} : vector<16x32xf32>, vector<32x32xf32>, vector<16x32xf32> -> vector<16x32xf32>
    %c0_19 = arith.constant 0 : index
    %c0_20 = arith.constant 0 : index
    %35 = vector.load %arg7[%c0_19, %c0_20] : memref<1x32xf32, #tpu.memory_space<vmem>>, vector<1x32xf32>
    %36 = vector.broadcast %35 : vector<1x32xf32> to vector<16x32xf32>
    %37 = arith.addf %34, %36 : vector<16x32xf32>
    %c0_21 = arith.constant 0 : index
    %c0_22 = arith.constant 0 : index
    %38 = vector.load %arg8[%c0_21, %c0_22] : memref<1x32xf32, #tpu.memory_space<vmem>>, vector<1x32xf32>
    %c0_23 = arith.constant 0 : index
    %c0_24 = arith.constant 0 : index
    %39 = vector.load %arg9[%c0_23, %c0_24] : memref<1x32xf32, #tpu.memory_space<vmem>>, vector<1x32xf32>
    %cst_25 = arith.constant dense<0.000000e+00> : vector<16xf32>
    %40 = vector.multi_reduction <add>, %37, %cst_25 [1] : vector<16x32xf32> to vector<16xf32>
    %41 = vector.shape_cast %40 : vector<16xf32> to vector<16x1xf32>
    %cst_26 = arith.constant 3.125000e-02 : f32
    %42 = vector.broadcast %cst_26 : f32 to vector<16x1xf32>
    %43 = arith.mulf %41, %42 : vector<16x1xf32>
    %44 = vector.broadcast %43 : vector<16x1xf32> to vector<16x32xf32>
    %45 = arith.subf %37, %44 : vector<16x32xf32>
    %46 = arith.mulf %45, %45 : vector<16x32xf32>
    %cst_27 = arith.constant dense<0.000000e+00> : vector<16xf32>
    %47 = vector.multi_reduction <add>, %46, %cst_27 [1] : vector<16x32xf32> to vector<16xf32>
    %48 = vector.shape_cast %47 : vector<16xf32> to vector<16x1xf32>
    %cst_28 = arith.constant 3.125000e-02 : f32
    %49 = vector.broadcast %cst_28 : f32 to vector<16x1xf32>
    %50 = arith.mulf %48, %49 : vector<16x1xf32>
    %cst_29 = arith.constant 9.99999974E-6 : f32
    %51 = vector.broadcast %cst_29 : f32 to vector<16x1xf32>
    %52 = arith.addf %50, %51 : vector<16x1xf32>
    %53 = math.rsqrt %52 : vector<16x1xf32>
    %54 = vector.broadcast %53 : vector<16x1xf32> to vector<16x32xf32>
    %55 = arith.mulf %45, %54 : vector<16x32xf32>
    %56 = vector.broadcast %38 : vector<1x32xf32> to vector<16x32xf32>
    %57 = arith.mulf %55, %56 : vector<16x32xf32>
    %58 = vector.broadcast %39 : vector<1x32xf32> to vector<16x32xf32>
    %59 = arith.addf %57, %58 : vector<16x32xf32>
    %cst_30 = arith.constant 0.000000e+00 : f32
    %60 = vector.broadcast %cst_30 : f32 to vector<16x32xf32>
    %61 = arith.cmpf oge, %59, %60 : vector<16x32xf32>
    %cst_31 = arith.constant 0.00999999977 : f32
    %62 = vector.broadcast %cst_31 : f32 to vector<16x32xf32>
    %63 = arith.mulf %62, %59 : vector<16x32xf32>
    %64 = arith.select %61, %59, %63 : vector<16x32xi1>, vector<16x32xf32>
    %65 = arith.addf %64, %32 : vector<16x32xf32>
    %c0_32 = arith.constant 0 : index
    %c0_33 = arith.constant 0 : index
    %66 = vector.load %arg10[%c0_32, %c0_33] : memref<32x32xf32, #tpu.memory_space<vmem>>, vector<32x32xf32>
    %cst_34 = arith.constant dense<0.000000e+00> : vector<16x32xf32>
    %67 = tpu.matmul %65, %66, %cst_34 {dimension_numbers = #tpu.dot_dimension_numbers<[1], [0], [0], [1], [0, 0, 1, 1], [], []>} : vector<16x32xf32>, vector<32x32xf32>, vector<16x32xf32> -> vector<16x32xf32>
    %c0_35 = arith.constant 0 : index
    %c0_36 = arith.constant 0 : index
    %68 = vector.load %arg11[%c0_35, %c0_36] : memref<1x32xf32, #tpu.memory_space<vmem>>, vector<1x32xf32>
    %69 = vector.broadcast %68 : vector<1x32xf32> to vector<16x32xf32>
    %70 = arith.addf %67, %69 : vector<16x32xf32>
    %c0_37 = arith.constant 0 : index
    %c0_38 = arith.constant 0 : index
    %71 = vector.load %arg12[%c0_37, %c0_38] : memref<1x32xf32, #tpu.memory_space<vmem>>, vector<1x32xf32>
    %c0_39 = arith.constant 0 : index
    %c0_40 = arith.constant 0 : index
    %72 = vector.load %arg13[%c0_39, %c0_40] : memref<1x32xf32, #tpu.memory_space<vmem>>, vector<1x32xf32>
    %cst_41 = arith.constant dense<0.000000e+00> : vector<16xf32>
    %73 = vector.multi_reduction <add>, %70, %cst_41 [1] : vector<16x32xf32> to vector<16xf32>
    %74 = vector.shape_cast %73 : vector<16xf32> to vector<16x1xf32>
    %cst_42 = arith.constant 3.125000e-02 : f32
    %75 = vector.broadcast %cst_42 : f32 to vector<16x1xf32>
    %76 = arith.mulf %74, %75 : vector<16x1xf32>
    %77 = vector.broadcast %76 : vector<16x1xf32> to vector<16x32xf32>
    %78 = arith.subf %70, %77 : vector<16x32xf32>
    %79 = arith.mulf %78, %78 : vector<16x32xf32>
    %cst_43 = arith.constant dense<0.000000e+00> : vector<16xf32>
    %80 = vector.multi_reduction <add>, %79, %cst_43 [1] : vector<16x32xf32> to vector<16xf32>
    %81 = vector.shape_cast %80 : vector<16xf32> to vector<16x1xf32>
    %cst_44 = arith.constant 3.125000e-02 : f32
    %82 = vector.broadcast %cst_44 : f32 to vector<16x1xf32>
    %83 = arith.mulf %81, %82 : vector<16x1xf32>
    %cst_45 = arith.constant 9.99999974E-6 : f32
    %84 = vector.broadcast %cst_45 : f32 to vector<16x1xf32>
    %85 = arith.addf %83, %84 : vector<16x1xf32>
    %86 = math.rsqrt %85 : vector<16x1xf32>
    %87 = vector.broadcast %86 : vector<16x1xf32> to vector<16x32xf32>
    %88 = arith.mulf %78, %87 : vector<16x32xf32>
    %89 = vector.broadcast %71 : vector<1x32xf32> to vector<16x32xf32>
    %90 = arith.mulf %88, %89 : vector<16x32xf32>
    %91 = vector.broadcast %72 : vector<1x32xf32> to vector<16x32xf32>
    %92 = arith.addf %90, %91 : vector<16x32xf32>
    %cst_46 = arith.constant 0.000000e+00 : f32
    %93 = vector.broadcast %cst_46 : f32 to vector<16x32xf32>
    %94 = arith.cmpf oge, %92, %93 : vector<16x32xf32>
    %cst_47 = arith.constant 0.00999999977 : f32
    %95 = vector.broadcast %cst_47 : f32 to vector<16x32xf32>
    %96 = arith.mulf %95, %92 : vector<16x32xf32>
    %97 = arith.select %94, %92, %96 : vector<16x32xi1>, vector<16x32xf32>
    %98 = arith.addf %97, %65 : vector<16x32xf32>
    %c0_48 = arith.constant 0 : index
    %c0_49 = arith.constant 0 : index
    %99 = vector.load %arg14[%c0_48, %c0_49] : memref<32x128xf32, #tpu.memory_space<vmem>>, vector<32x128xf32>
    %cst_50 = arith.constant dense<0.000000e+00> : vector<16x128xf32>
    %100 = tpu.matmul %98, %99, %cst_50 {dimension_numbers = #tpu.dot_dimension_numbers<[1], [0], [0], [1], [0, 0, 1, 1], [], []>} : vector<16x32xf32>, vector<32x128xf32>, vector<16x128xf32> -> vector<16x128xf32>
    %c0_51 = arith.constant 0 : index
    %c0_52 = arith.constant 0 : index
    %101 = vector.load %arg15[%c0_51, %c0_52] : memref<1x128xf32, #tpu.memory_space<vmem>>, vector<1x128xf32>
    %102 = vector.broadcast %101 : vector<1x128xf32> to vector<16x128xf32>
    %103 = arith.addf %100, %102 : vector<16x128xf32>
    %c0_53 = arith.constant 0 : index
    %c0_54 = arith.constant 0 : index
    %104 = vector.load %arg16[%c0_53, %c0_54] : memref<16x128xf32, #tpu.memory_space<vmem>>, vector<16x128xf32>
    tpu.vector_store %arg16[%c0_53, %c0_54], %103 {strides = array<i32>} : memref<16x128xf32, #tpu.memory_space<vmem>>, vector<16x128xf32>,
    return
  }
  func.func @transform_0(%arg0: i32) -> (i32, i32) {
    %c0_i32 = arith.constant 0 : i32
    %c0_i32_0 = arith.constant 0 : i32
    return %arg0, %c0_i32 : i32, i32
  }
  func.func @transform_1(%arg0: i32) -> (i32, i32) {
    %c0_i32 = arith.constant 0 : i32
    %c0_i32_0 = arith.constant 0 : i32
    %c0_i32_1 = arith.constant 0 : i32
    return %c0_i32, %c0_i32_0 : i32, i32
  }
  func.func @transform_2(%arg0: i32) -> (i32, i32) {
    %c0_i32 = arith.constant 0 : i32
    %c0_i32_0 = arith.constant 0 : i32
    %c0_i32_1 = arith.constant 0 : i32
    return %c0_i32, %c0_i32_0 : i32, i32
  }
  func.func @transform_3(%arg0: i32) -> (i32, i32) {
    %c0_i32 = arith.constant 0 : i32
    %c0_i32_0 = arith.constant 0 : i32
    %c0_i32_1 = arith.constant 0 : i32
    return %c0_i32, %c0_i32_0 : i32, i32
  }
  func.func @transform_4(%arg0: i32) -> (i32, i32) {
    %c0_i32 = arith.constant 0 : i32
    %c0_i32_0 = arith.constant 0 : i32
    %c0_i32_1 = arith.constant 0 : i32
    return %c0_i32, %c0_i32_0 : i32, i32
  }
  func.func @transform_5(%arg0: i32) -> (i32, i32) {
    %c0_i32 = arith.constant 0 : i32
    %c0_i32_0 = arith.constant 0 : i32
    %c0_i32_1 = arith.constant 0 : i32
    return %c0_i32, %c0_i32_0 : i32, i32
  }
  func.func @transform_6(%arg0: i32) -> (i32, i32) {
    %c0_i32 = arith.constant 0 : i32
    %c0_i32_0 = arith.constant 0 : i32
    %c0_i32_1 = arith.constant 0 : i32
    return %c0_i32, %c0_i32_0 : i32, i32
  }
  func.func @transform_7(%arg0: i32) -> (i32, i32) {
    %c0_i32 = arith.constant 0 : i32
    %c0_i32_0 = arith.constant 0 : i32
    %c0_i32_1 = arith.constant 0 : i32
    return %c0_i32, %c0_i32_0 : i32, i32
  }
  func.func @transform_8(%arg0: i32) -> (i32, i32) {
    %c0_i32 = arith.constant 0 : i32
    %c0_i32_0 = arith.constant 0 : i32
    %c0_i32_1 = arith.constant 0 : i32
    return %c0_i32, %c0_i32_0 : i32, i32
  }
  func.func @transform_9(%arg0: i32) -> (i32, i32) {
    %c0_i32 = arith.constant 0 : i32
    %c0_i32_0 = arith.constant 0 : i32
    %c0_i32_1 = arith.constant 0 : i32
    return %c0_i32, %c0_i32_0 : i32, i32
  }
  func.func @transform_10(%arg0: i32) -> (i32, i32) {
    %c0_i32 = arith.constant 0 : i32
    %c0_i32_0 = arith.constant 0 : i32
    %c0_i32_1 = arith.constant 0 : i32
    return %c0_i32, %c0_i32_0 : i32, i32
  }
  func.func @transform_11(%arg0: i32) -> (i32, i32) {
    %c0_i32 = arith.constant 0 : i32
    %c0_i32_0 = arith.constant 0 : i32
    %c0_i32_1 = arith.constant 0 : i32
    return %c0_i32, %c0_i32_0 : i32, i32
  }
  func.func @transform_12(%arg0: i32) -> (i32, i32) {
    %c0_i32 = arith.constant 0 : i32
    %c0_i32_0 = arith.constant 0 : i32
    %c0_i32_1 = arith.constant 0 : i32
    return %c0_i32, %c0_i32_0 : i32, i32
  }
  func.func @transform_13(%arg0: i32) -> (i32, i32) {
    %c0_i32 = arith.constant 0 : i32
    %c0_i32_0 = arith.constant 0 : i32
    %c0_i32_1 = arith.constant 0 : i32
    return %c0_i32, %c0_i32_0 : i32, i32
  }
  func.func @transform_14(%arg0: i32) -> (i32, i32) {
    %c0_i32 = arith.constant 0 : i32
    %c0_i32_0 = arith.constant 0 : i32
    %c0_i32_1 = arith.constant 0 : i32
    return %c0_i32, %c0_i32_0 : i32, i32
  }
  func.func @transform_15(%arg0: i32) -> (i32, i32) {
    %c0_i32 = arith.constant 0 : i32
    %c0_i32_0 = arith.constant 0 : i32
    return %arg0, %c0_i32 : i32, i32
  }
}

</mosaic_0001>

<bundles_post_ra>
// kernel: tpu_custom_call.1
= control target key start
LH: loop header
LB: loop body
LE: loop exit
PB: predicated region body
PF: predicated region fallthrough
CT: control target
= control target key end

     0   :  { %20 = vsyncpa [#allocation3], 0  ;;  %s1068_s0 = inlined_call_operand.hbm [shape: f32[16,16], index: 0, kind: input, shape index: {}]   ;;  %s1069_s1 = inlined_call_operand.hbm [shape: f32[16,32], index: 1, kind: input, shape index: {}]   ;;  %s1070_s2 = inlined_call_operand.vmem [shape: f32[1,32], index: 2, kind: input, shape index: {}]   ;;  %s1071_s3 = inlined_call_operand.vmem [shape: f32[1,32], index: 3, kind: input, shape index: {}]   ;;  %s1072_s4 = inlined_call_operand.vmem [shape: f32[1,32], index: 4, kind: input, shape index: {}]   ;;  %s1073_s5 = inlined_call_operand.hbm [shape: f32[32,32], index: 5, kind: input, shape index: {}]   ;;  %s1074_s6 = inlined_call_operand.vmem [shape: f32[1,32], index: 6, kind: input, shape index: {}]   ;;  %s1075_s7 = inlined_call_operand.vmem [shape: f32[1,32], index: 7, kind: input, shape index: {}]   ;;  %s1076_s8 = inlined_call_operand.vmem [shape: f32[1,32], index: 8, kind: input, shape index: {}]   ;;  %s1077_s9 = inlined_call_operand.hbm [shape: f32[32,32], index: 9, kind: input, shape index: {}]   ;;  %s1078_s10 = inlined_call_operand.vmem [shape: f32[1,32], index: 10, kind: input, shape index: {}]   ;;  %s1079_s11 = inlined_call_operand.vmem [shape: f32[1,32], index: 11, kind: input, shape index: {}]   ;;  %s1080_s12 = inlined_call_operand.vmem [shape: f32[1,32], index: 12, kind: input, shape index: {}]   ;;  %s1081_s13 = inlined_call_operand.hbm [shape: f32[32,128], index: 13, kind: input, shape index: {}]   ;;  %s1082_s14 = inlined_call_operand.vmem [shape: f32[1,128], index: 14, kind: input, shape index: {}]   ;;  %s1083_s15 = inlined_call_operand.hbm [shape: f32[16,128], index: 15, kind: output, shape index: {}]  }
   0x1   :  { %21 = vsyncpa [#allocation6], 0 }
   0x2   :  { %22 = vsyncpa [#allocation9], 0 }
   0x3   :  { %23 = vsyncpa [#allocation4], 0  ;;  %s892_s18 = smov [#allocation5]   ;;  %s893_s20 = smov [#allocation8]  }
   0x4   :  { %s41_s19 = sshll.u32 %s892_s18, 4  ;;  %s77_s21 = sshll.u32 %s893_s20, 4  ;;  %s42_s19 = int_to_ptr.vmem [resolvable:$true] %s41_s19  ;;  %s78_s21 = int_to_ptr.vmem [resolvable:$true] %s77_s21 }
   0x5   :  { %s772_s22 = scalar_lea.vmem %s42_s19, 256  ;;  %p777_p1 = scmp.lt.s32.totalorder %s42_s19, %s42_s19 }
   0x6   :  { %p773_p0 = scmp.ne.s32.totalorder %s42_s19, %s772_s22  ;;  %p778_p2 = scmp.lt.s32.totalorder %s772_s22, %s772_s22 }
   0x8   :  { %p779_p3 = por %p778_p2, %p777_p1 }
   0xa   :  { %p780_p4 = pnand %p779_p3, %p773_p0 }
   0xc   :  { %783 = shalt.err (!%p780_p4)
}
   0xd   :  { %s894_s23 = smov 128   ;;  %s895_s24 = smov 8  }
   0xe   :  { %47 = dma.hbm_to_vmem [thread:$0]  %s1069_s1, 256, %s42_s19, [#allocation6], %s894_s23, %s894_s23, %s895_s24  }
   0xf   :  { %s792_s27 = scalar_lea.vmem %s78_s21, 512  ;;  %p797_p6 = scmp.lt.s32.totalorder %s78_s21, %s78_s21 }
  0x10   :  { %p793_p5 = scmp.ne.s32.totalorder %s78_s21, %s792_s27  ;;  %p798_p7 = scmp.lt.s32.totalorder %s792_s27, %s792_s27 }
  0x12   :  { %p799_p8 = por %p798_p7, %p797_p6 }
  0x14   :  { %p800_p9 = pnand %p799_p8, %p793_p5 }
  0x16   :  { %803 = shalt.err (!%p800_p9)
}
  0x17   :  { %83 = dma.hbm_to_vmem [thread:$0]  %s1077_s9, 512, %s78_s21, [#allocation9], %s894_s23, %s894_s23, %s895_s24  }
  0x18   :  { %s896_s30 = smov [#allocation2]   ;;  %s897_s17 = smov [#allocation7]  }
  0x19   :  { %s29_s16 = sshll.u32 %s896_s30, 4  ;;  %s59_s18 = sshll.u32 %s897_s17, 4  ;;  %s30_s16 = int_to_ptr.vmem [resolvable:$true] %s29_s16  ;;  %s60_s18 = int_to_ptr.vmem [resolvable:$true] %s59_s18 }
  0x1a   :  { %s812_s1 = scalar_lea.vmem %s30_s16, 256  ;;  %p817_p11 = scmp.lt.s32.totalorder %s30_s16, %s30_s16 }
  0x1b   :  { %p813_p10 = scmp.ne.s32.totalorder %s30_s16, %s812_s1  ;;  %p818_p12 = scmp.lt.s32.totalorder %s812_s1, %s812_s1 }
  0x1d   :  { %p819_p13 = por %p818_p12, %p817_p11 }
  0x1f   :  { %p820_p0 = pnand %p819_p13, %p813_p10 }
  0x21   :  { %823 = shalt.err (!%p820_p0)
}
  0x22   :  { %35 = dma.hbm_to_vmem [thread:$0]  %s1068_s0, 256, %s30_s16, [#allocation3], %s894_s23, %s894_s23, %s895_s24  }
  0x23   :  { %s832_s9 = scalar_lea.vmem %s60_s18, 512  ;;  %p837_p2 = scmp.lt.s32.totalorder %s60_s18, %s60_s18 }
  0x24   :  { %p833_p1 = scmp.ne.s32.totalorder %s60_s18, %s832_s9  ;;  %p838_p3 = scmp.lt.s32.totalorder %s832_s9, %s832_s9 }
  0x26   :  { %p839_p4 = por %p838_p3, %p837_p2 }
  0x28   :  { %p840_p5 = pnand %p839_p4, %p833_p1 }
  0x2a   :  { %843 = shalt.err (!%p840_p5)
}
  0x2b   :  { %65 = dma.hbm_to_vmem [thread:$0]  %s1073_s5, 512, %s60_s18, [#allocation6], %s894_s23, %s894_s23, %s895_s24  }
  0x2c   :  { %s898_s25 = smov [#allocation10]  }
  0x2d   :  { %s95_s26 = sshll.u32 %s898_s25, 4  ;;  %s96_s26 = int_to_ptr.vmem [resolvable:$true] %s95_s26 }
  0x2e   :  { %s852_s27 = scalar_lea.vmem %s96_s26, 512  ;;  %p857_p7 = scmp.lt.s32.totalorder %s96_s26, %s96_s26 }
  0x2f   :  { %p853_p6 = scmp.ne.s32.totalorder %s96_s26, %s852_s27  ;;  %p858_p8 = scmp.lt.s32.totalorder %s852_s27, %s852_s27 }
  0x31   :  { %p859_p9 = por %p858_p8, %p857_p7 }
  0x33   :  { %p860_p10 = pnand %p859_p9, %p853_p6 }
  0x35   :  { %863 = shalt.err (!%p860_p10)
}
  0x36   :  { %101 = dma.hbm_to_vmem [thread:$0]  %s1081_s13, 512, %s96_s26, [#allocation9], %s894_s23, %s894_s23, %s895_s24  }
  0x37   :  { %884 = dma.done.wait [#allocation3], 256  }
  0x38   :  { %885 = vsyncadd [#allocation3], 4294967040 }
  0x39   :  { %886 = dma.done.wait [#allocation6], 768  }
  0x3a   :  { %887 = vsyncadd [#allocation6], 4294966528 }
  0x3b   :  { %888 = dma.done.wait [#allocation9], 1024  }
  0x3c   :  { %889 = vsyncadd [#allocation9], 4294966272  ;;  %vm130_vm0 = vcmask 130048   ;;  %v122_v0 = vld [vmem:[#allocation5 + $0x8] sm:$0xff]  ;;  %v121_v1 = vld [vmem:[#allocation5] sm:$0xff]  ;;  %vm214_vm1 = vcmask 261120  }
  0x3d   :  { %v119_v2 = vld [vmem:[#allocation2] sm:$0xff]  ;;  %704 = vmatprep.subr.mxu0 %v122_v0  ;;  %v120_v3 = vld [vmem:[#allocation2 + $0x8] sm:$0xff]  ;;  %v266_v21 = vld [vmem:[#allocation7 + $0x18] sm:$0xff] }
  0x3e   :  { %708 = vmatprep.mubr.msk.f32.mxu0 %vm130_vm0, %v119_v2  ;;  %705 = vmatpush3.msra.mxu0 %v122_v0  ;;  %v664_v5 = vld [vmem:[%s1070_s2] ss:$0 sm:$0xff]  ;;  %v265_v22 = vld [vmem:[#allocation7 + $0x10] sm:$0xff]  ;;  %v264_v23 = vld [vmem:[#allocation7 + $0x8] sm:$0xff] }
  0x3f   :  { %706 = vmatprep.subr.mxu0 %v121_v1  ;;  %711 = vmatprep.subr.mxu1 %v266_v21  ;;  %v263_v24 = vld [vmem:[#allocation7] sm:$0xff]  ;;  %v410_v62 = vld [vmem:[#allocation8 + $0x18] sm:$0xff]  ;;  %v409_v63 = vld [vmem:[#allocation8 + $0x10] sm:$0xff] }
  0x40   :  { %707 = vmatpush3.msra.mxu0 %v121_v1  ;;  %712 = vmatpush3.msra.mxu1 %v266_v21  ;;  %v667_v32 = vld [vmem:[%s1071_s3] ss:$0 sm:$0xff]  ;;  %v408_v0 = vld [vmem:[#allocation8 + $0x8] sm:$0xff] }
  0x41   :  { %709 = vmatmul.mubr.msk.f32.vlgmr.msra.gmra.mxu0 %vm130_vm0, %v120_v3  ;;  %713 = vmatprep.subr.mxu1 %v265_v22  ;;  %v668_v34 = vld [vmem:[%s1072_s4] ss:$0 sm:$0xff] }
  0x42   :  { %714 = vmatpush3.msra.mxu1 %v265_v22  ;;  %v669_v45 = vld [vmem:[%s1074_s6] ss:$0 sm:$0xff]  ;;  %722 = vmatprep.subr.mxu0 %v410_v62 }
  0x43   :  { %715 = vmatprep.subr.mxu1 %v264_v23  ;;  %723 = vmatpush3.msra.mxu0 %v410_v62  ;;  %v407_v1 = vld [vmem:[#allocation8] sm:$0xff] }
  0x44   :  { %716 = vmatpush3.msra.mxu1 %v264_v23  ;;  %724 = vmatprep.subr.mxu0 %v409_v63 }
  0x45   :  { %717 = vmatprep.subr.mxu1 %v263_v24  ;;  %725 = vmatpush3.msra.mxu0 %v409_v63 }
  0x46   :  { %718 = vmatpush3.msra.mxu1 %v263_v24  ;;  %726 = vmatprep.subr.mxu0 %v408_v0  ;;  %v674_v24 = vld [vmem:[%s1078_s10] ss:$0 sm:$0xff] }
  0x47   :  { %727 = vmatpush3.msra.mxu0 %v408_v0 }
  0x48   :  { %728 = vmatprep.subr.mxu0 %v407_v1 }
  0x49   :  { %729 = vmatpush3.msra.mxu0 %v407_v1 }
 0x101   :  { %v710_v4 = vpop.f32.mrf.mxu0 }
 0x102   :  { %v209_v8 = vadd.f32 %v710_v4, %v664_v5 }
 0x103   :  { %v203_v6 = vpop.f32.mrf.mxu0 }
 0x104   :  { %v204_v7 = vadd.f32 %v664_v5, %v203_v6  ;;  %v218_v10 = vsel %vm214_vm1, %v209_v8, 0.0 }
 0x106   :  { %v215_v9 = vsel %vm214_vm1, %v204_v7, 0.0 }
 0x107   :  { %216 = vadd.xlane.f32.xlu0 %v215_v9  ;;  %v672_v9 = vld [vmem:[%s1075_s7] ss:$0 sm:$0xff] }
 0x10b   :  { %219 = vadd.xlane.f32.xlu0 %v218_v10 }
 0x190   :  { %v217_v11 = vpop.xlane.xlu0 %216 }
 0x191   :  { %v221_v12 = vmul.f32 0.03125, %v217_v11 }
 0x193   :  { %v223_v13 = vsub.f32 %v204_v7, %v221_v12  ;;  %v673_v12 = vld [vmem:[%s1076_s8] ss:$0 sm:$0xff] }
 0x194   :  { %v220_v14 = vpop.xlane.xlu0 %219 }
 0x195   :  { %v222_v15 = vmul.f32 0.03125, %v220_v14  ;;  %v225_v16 = vmul.f32 %v223_v13, %v223_v13 }
 0x197   :  { %v224_v17 = vsub.f32 %v209_v8, %v222_v15  ;;  %v227_v18 = vsel %vm214_vm1, %v225_v16, 0.0 }
 0x198   :  { %228 = vadd.xlane.f32.xlu1 %v227_v18 }
 0x199   :  { %v226_v19 = vmul.f32 %v224_v17, %v224_v17 }
 0x19b   :  { %v230_v20 = vsel %vm214_vm1, %v226_v19, 0.0 }
 0x19c   :  { %231 = vadd.xlane.f32.xlu1 %v230_v20 }
 0x221   :  { %v229_v25 = vpop.xlane.xlu1 %228 }
 0x222   :  { %v233_v26 = vmul.f32 0.03125, %v229_v25 }
 0x224   :  { %v235_v27 = vadd.f32 1e-05, %v233_v26 }
 0x225   :  { %v232_v28 = vpop.xlane.xlu1 %231 }
 0x226   :  { %752 = vrsqrt.f32 %v235_v27  ;;  %v234_v29 = vmul.f32 0.03125, %v232_v28 }
 0x228   :  { %v236_v30 = vadd.f32 1e-05, %v234_v29 }
 0x22a   :  { %754 = vrsqrt.f32 %v236_v30 }
 0x233   :  { %v753_v31 = vpop.eup %752 }
 0x234   :  { %v239_v33 = vmul.f32 %v753_v31, %v223_v13 }
 0x236   :  { %v247_v35 = vmul.f32 %v667_v32, %v239_v33 }
 0x237   :  { %v755_v36 = vpop.eup %754 }
 0x238   :  { %v240_v37 = vmul.f32 %v755_v36, %v224_v17  ;;  %v255_v38 = vadd.f32 %v668_v34, %v247_v35 }
 0x23a   :  { %v248_v39 = vmul.f32 %v667_v32, %v240_v37  ;;  %vm257_vm2 = vcmp.ge.f32.partialorder %v255_v38, 0.0  ;;  %v259_v40 = vmul.f32 0.01, %v255_v38 }
 0x23c   :  { %v256_v41 = vadd.f32 %v668_v34, %v248_v39  ;;  %v1023_v42 = vsel %vm257_vm2, %v255_v38, %v259_v40 }
 0x23d   :  { %719 = vmatprep.mubr.msk.f32.mxu1 %vm214_vm1, %v1023_v42 }
 0x23e   :  { %vm258_vm3 = vcmp.ge.f32.partialorder %v256_v41, 0.0  ;;  %v260_v43 = vmul.f32 0.01, %v256_v41 }
 0x240   :  { %v262_v44 = vsel %vm258_vm3, %v256_v41, %v260_v43  ;;  %v554_v41 = vld [vmem:[#allocation10 + $0x18] sm:$0xff]  ;;  %v552_v43 = vld [vmem:[#allocation10 + $0x8] sm:$0xff] }
 0x241   :  { %720 = vmatmul.mubr.msk.f32.vlgmr.msra.gmra.mxu1 %vm214_vm1, %v262_v44  ;;  %733 = vmatprep.subr.mxu1 %v554_v41 }
 0x242   :  { %734 = vmatpush3.msra.mxu1 %v554_v41 }
 0x301   :  { %v721_v46 = vpop.f32.mrf.mxu1 }
 0x302   :  { %v352_v47 = vadd.f32 %v721_v46, %v669_v45 }
 0x303   :  { %v346_v48 = vpop.f32.mrf.mxu1 }
 0x304   :  { %v347_v49 = vadd.f32 %v669_v45, %v346_v48  ;;  %v360_v50 = vsel %vm214_vm1, %v352_v47, 0.0 }
 0x305   :  { %361 = vadd.xlane.f32.xlu1 %v360_v50 }
 0x306   :  { %v357_v51 = vsel %vm214_vm1, %v347_v49, 0.0 }
 0x307   :  { %358 = vadd.xlane.f32.xlu0 %v357_v51 }
 0x38e   :  { %v362_v52 = vpop.xlane.xlu1 %361 }
 0x38f   :  { %v364_v53 = vmul.f32 0.03125, %v362_v52  ;;  %v677_v52 = vld [vmem:[%s1079_s11] ss:$0 sm:$0xff] }
 0x390   :  { %v359_v54 = vpop.xlane.xlu0 %358 }
 0x391   :  { %v366_v55 = vsub.f32 %v352_v47, %v364_v53  ;;  %v363_v56 = vmul.f32 0.03125, %v359_v54 }
 0x393   :  { %v365_v57 = vsub.f32 %v347_v49, %v363_v56  ;;  %v368_v58 = vmul.f32 %v366_v55, %v366_v55 }
 0x395   :  { %v372_v59 = vsel %vm214_vm1, %v368_v58, 0.0  ;;  %v367_v60 = vmul.f32 %v365_v57, %v365_v57 }
 0x396   :  { %373 = vadd.xlane.f32.xlu1 %v372_v59 }
 0x397   :  { %v369_v61 = vsel %vm214_vm1, %v367_v60, 0.0 }
 0x398   :  { %370 = vadd.xlane.f32.xlu0 %v369_v61 }
 0x41f   :  { %v374_v2 = vpop.xlane.xlu1 %373 }
 0x420   :  { %v376_v3 = vmul.f32 0.03125, %v374_v2 }
 0x421   :  { %v371_v4 = vpop.xlane.xlu0 %370 }
 0x422   :  { %v378_v5 = vadd.f32 1e-05, %v376_v3  ;;  %v375_v6 = vmul.f32 0.03125, %v371_v4  ;;  %v679_v3 = vld [vmem:[%s1082_s14] ss:$0 sm:$0xff] }
 0x424   :  { %756 = vrsqrt.f32 %v378_v5  ;;  %v377_v7 = vadd.f32 1e-05, %v375_v6 }
 0x426   :  { %758 = vrsqrt.f32 %v377_v7 }
 0x431   :  { %v757_v8 = vpop.eup %756 }
 0x432   :  { %v382_v10 = vmul.f32 %v757_v8, %v366_v55  ;;  %v678_v55 = vld [vmem:[%s1080_s12] ss:$0 sm:$0xff]  ;;  %s899_s12 = smov [#allocation11]  }
 0x433   :  { %v759_v11 = vpop.eup %758  ;;  %s650_s22 = sshll.u32 %s899_s12, 4  ;;  %s651_s22 = int_to_ptr.vmem [resolvable:$true] %s650_s22 }
 0x434   :  { %v381_v13 = vmul.f32 %v759_v11, %v365_v57  ;;  %v390_v14 = vmul.f32 %v672_v9, %v382_v10  ;;  %s864_s25 = scalar_lea.vmem %s651_s22, 256  ;;  %p869_p12 = scmp.lt.s32.totalorder %s651_s22, %s651_s22 }
 0x435   :  { %p865_p11 = scmp.ne.s32.totalorder %s651_s22, %s864_s25  ;;  %p870_p13 = scmp.lt.s32.totalorder %s864_s25, %s864_s25 }
 0x436   :  { %v389_v15 = vmul.f32 %v672_v9, %v381_v13  ;;  %v398_v16 = vadd.f32 %v673_v12, %v390_v14 }
 0x437   :  { %p871_p0 = por %p870_p13, %p869_p12 }
 0x438   :  { %v397_v17 = vadd.f32 %v673_v12, %v389_v15  ;;  %vm400_vm4 = vcmp.ge.f32.partialorder %v398_v16, 0.0  ;;  %v402_v18 = vmul.f32 0.01, %v398_v16 }
 0x439   :  { %p872_p1 = pnand %p871_p0, %p865_p11 }
 0x43a   :  { %vm399_vm5 = vcmp.ge.f32.partialorder %v397_v17, 0.0  ;;  %v401_v19 = vmul.f32 0.01, %v397_v17  ;;  %v404_v20 = vsel %vm400_vm4, %v398_v16, %v402_v18 }
 0x43b   :  { %v406_v23 = vadd.f32 %v404_v20, %v262_v44  ;;  %v551_v44 = vld [vmem:[#allocation10] sm:$0xff] }
 0x43c   :  { %v403_v21 = vsel %vm399_vm5, %v397_v17, %v401_v19 }
 0x43d   :  { %v405_v22 = vadd.f32 %v403_v21, %v1023_v42  ;;  %v553_v42 = vld [vmem:[#allocation10 + $0x10] sm:$0xff] }
 0x43e   :  { %735 = vmatprep.subr.mxu1 %v553_v42 }
 0x43f   :  { %730 = vmatprep.mubr.msk.f32.mxu0 %vm214_vm1, %v405_v22  ;;  %736 = vmatpush3.msra.mxu1 %v553_v42 }
 0x440   :  { %731 = vmatmul.mubr.msk.f32.vlgmr.msra.gmra.mxu0 %vm214_vm1, %v406_v23  ;;  %737 = vmatprep.subr.mxu1 %v552_v43 }
 0x441   :  { %738 = vmatpush3.msra.mxu1 %v552_v43 }
 0x442   :  { %739 = vmatprep.subr.mxu1 %v551_v44 }
 0x443   :  { %740 = vmatpush3.msra.mxu1 %v551_v44 }
 0x500   :  { %v732_v25 = vpop.f32.mrf.mxu0 }
 0x501   :  { %v496_v26 = vadd.f32 %v732_v25, %v674_v24 }
 0x502   :  { %v490_v27 = vpop.f32.mrf.mxu0 }
 0x503   :  { %v491_v28 = vadd.f32 %v674_v24, %v490_v27  ;;  %v504_v29 = vsel %vm214_vm1, %v496_v26, 0.0 }
 0x504   :  { %505 = vadd.xlane.f32.xlu1 %v504_v29 }
 0x505   :  { %v501_v30 = vsel %vm214_vm1, %v491_v28, 0.0 }
 0x506   :  { %502 = vadd.xlane.f32.xlu0 %v501_v30 }
 0x58d   :  { %v506_v31 = vpop.xlane.xlu1 %505 }
 0x58e   :  { %v508_v32 = vmul.f32 0.03125, %v506_v31 }
 0x58f   :  { %v503_v33 = vpop.xlane.xlu0 %502 }
 0x590   :  { %v510_v34 = vsub.f32 %v496_v26, %v508_v32  ;;  %v507_v35 = vmul.f32 0.03125, %v503_v33 }
 0x592   :  { %v509_v36 = vsub.f32 %v491_v28, %v507_v35  ;;  %v512_v37 = vmul.f32 %v510_v34, %v510_v34 }
 0x594   :  { %v516_v38 = vsel %vm214_vm1, %v512_v37, 0.0  ;;  %v511_v39 = vmul.f32 %v509_v36, %v509_v36 }
 0x595   :  { %517 = vadd.xlane.f32.xlu1 %v516_v38 }
 0x596   :  { %v513_v40 = vsel %vm214_vm1, %v511_v39, 0.0 }
 0x597   :  { %514 = vadd.xlane.f32.xlu0 %v513_v40 }
 0x61e   :  { %v518_v45 = vpop.xlane.xlu1 %517 }
 0x61f   :  { %v520_v46 = vmul.f32 0.03125, %v518_v45 }
 0x620   :  { %v515_v47 = vpop.xlane.xlu0 %514 }
 0x621   :  { %v522_v48 = vadd.f32 1e-05, %v520_v46  ;;  %v519_v49 = vmul.f32 0.03125, %v515_v47 }
 0x623   :  { %760 = vrsqrt.f32 %v522_v48  ;;  %v521_v50 = vadd.f32 1e-05, %v519_v49 }
 0x625   :  { %762 = vrsqrt.f32 %v521_v50 }
 0x630   :  { %v761_v51 = vpop.eup %760 }
 0x631   :  { %v526_v53 = vmul.f32 %v761_v51, %v510_v34 }
 0x632   :  { %v763_v54 = vpop.eup %762 }
 0x633   :  { %v525_v56 = vmul.f32 %v763_v54, %v509_v36  ;;  %v534_v57 = vmul.f32 %v677_v52, %v526_v53 }
 0x635   :  { %v533_v58 = vmul.f32 %v677_v52, %v525_v56  ;;  %v542_v59 = vadd.f32 %v678_v55, %v534_v57 }
 0x637   :  { %v541_v60 = vadd.f32 %v678_v55, %v533_v58  ;;  %vm544_vm6 = vcmp.ge.f32.partialorder %v542_v59, 0.0  ;;  %v546_v61 = vmul.f32 0.01, %v542_v59 }
 0x639   :  { %vm543_vm7 = vcmp.ge.f32.partialorder %v541_v60, 0.0  ;;  %v545_v62 = vmul.f32 0.01, %v541_v60  ;;  %v548_v63 = vsel %vm544_vm6, %v542_v59, %v546_v61 }
 0x63a   :  { %v550_v2 = vadd.f32 %v548_v63, %v406_v23 }
 0x63b   :  { %v547_v0 = vsel %vm543_vm7, %v541_v60, %v545_v62 }
 0x63c   :  { %v549_v1 = vadd.f32 %v547_v0, %v405_v22 }
 0x63e   :  { %741 = vmatprep.mubr.msk.f32.mxu1 %vm214_vm1, %v549_v1 }
 0x63f   :  { %742 = vmatmul.mubr.msk.f32.vlgmr.msra.gmra.mxu1 %vm214_vm1, %v550_v2 }
 0x6ff   :  { %v743_v4 = vpop.f32.mrf.mxu1 }
 0x700   :  { %v640_v5 = vadd.f32 %v743_v4, %v679_v3 }
 0x701   :  { %v634_v6 = vpop.f32.mrf.mxu1 }
 0x702   :  { %644 = vst [vmem:[#allocation11 + $0x8] sm:$0xff] %v640_v5  ;;  %v635_v7 = vadd.f32 %v679_v3, %v634_v6 }
 0x704   :  { %643 = vst [vmem:[#allocation11] sm:$0xff] %v635_v7 }
 0x705   :  { %875 = shalt.err (!%p872_p1)
}
 0x706   :  { %656 = dma.vmem_to_hbm [thread:$0]  %s651_s22, 256, %s1083_s15, [#allocation4], %s894_s23, %s894_s23, %s895_s24  }
 0x707   :  { %890 = dma.done.wait [#allocation4], 256  }
 0x708   :  { %891 = vsyncadd [#allocation4], 4294967040 }
 0x709   :  { %660 = vsyncpa [#allocation3], 1 }
 0x70a   :  { %661 = vsyncpa [#allocation6], 1 }
 0x70b   :  { %662 = vsyncpa [#allocation9], 1 }
 0x70c   :  { %663 = vsyncpa [#allocation4], 1 }

// kernel: tpu_custom_call.1
= control target key start
LH: loop header
LB: loop body
LE: loop exit
PB: predicated region body
PF: predicated region fallthrough
CT: control target
= control target key end

     0   :  { %20 = vsyncpa [#allocation3], 0  ;;  %s1068_s0 = inlined_call_operand.hbm [shape: f32[16,16], index: 0, kind: input, shape index: {}]   ;;  %s1069_s1 = inlined_call_operand.hbm [shape: f32[16,32], index: 1, kind: input, shape index: {}]   ;;  %s1070_s2 = inlined_call_operand.vmem [shape: f32[1,32], index: 2, kind: input, shape index: {}]   ;;  %s1071_s3 = inlined_call_operand.vmem [shape: f32[1,32], index: 3, kind: input, shape index: {}]   ;;  %s1072_s4 = inlined_call_operand.vmem [shape: f32[1,32], index: 4, kind: input, shape index: {}]   ;;  %s1073_s5 = inlined_call_operand.hbm [shape: f32[32,32], index: 5, kind: input, shape index: {}]   ;;  %s1074_s6 = inlined_call_operand.vmem [shape: f32[1,32], index: 6, kind: input, shape index: {}]   ;;  %s1075_s7 = inlined_call_operand.vmem [shape: f32[1,32], index: 7, kind: input, shape index: {}]   ;;  %s1076_s8 = inlined_call_operand.vmem [shape: f32[1,32], index: 8, kind: input, shape index: {}]   ;;  %s1077_s9 = inlined_call_operand.hbm [shape: f32[32,32], index: 9, kind: input, shape index: {}]   ;;  %s1078_s10 = inlined_call_operand.vmem [shape: f32[1,32], index: 10, kind: input, shape index: {}]   ;;  %s1079_s11 = inlined_call_operand.vmem [shape: f32[1,32], index: 11, kind: input, shape index: {}]   ;;  %s1080_s12 = inlined_call_operand.vmem [shape: f32[1,32], index: 12, kind: input, shape index: {}]   ;;  %s1081_s13 = inlined_call_operand.hbm [shape: f32[32,128], index: 13, kind: input, shape index: {}]   ;;  %s1082_s14 = inlined_call_operand.vmem [shape: f32[1,128], index: 14, kind: input, shape index: {}]   ;;  %s1083_s15 = inlined_call_operand.hbm [shape: f32[16,128], index: 15, kind: output, shape index: {}]  }
   0x1   :  { %21 = vsyncpa [#allocation6], 0 }
   0x2   :  { %22 = vsyncpa [#allocation9], 0 }
   0x3   :  { %23 = vsyncpa [#allocation4], 0  ;;  %s892_s18 = smov [#allocation5]   ;;  %s893_s20 = smov [#allocation8]  }
   0x4   :  { %s41_s19 = sshll.u32 %s892_s18, 4  ;;  %s77_s21 = sshll.u32 %s893_s20, 4  ;;  %s42_s19 = int_to_ptr.vmem [resolvable:$true] %s41_s19  ;;  %s78_s21 = int_to_ptr.vmem [resolvable:$true] %s77_s21 }
   0x5   :  { %s772_s22 = scalar_lea.vmem %s42_s19, 256  ;;  %p777_p1 = scmp.lt.s32.totalorder %s42_s19, %s42_s19 }
   0x6   :  { %p773_p0 = scmp.ne.s32.totalorder %s42_s19, %s772_s22  ;;  %p778_p2 = scmp.lt.s32.totalorder %s772_s22, %s772_s22 }
   0x8   :  { %p779_p3 = por %p778_p2, %p777_p1 }
   0xa   :  { %p780_p4 = pnand %p779_p3, %p773_p0 }
   0xc   :  { %783 = shalt.err (!%p780_p4)
}
   0xd   :  { %s894_s23 = smov 128   ;;  %s895_s24 = smov 8  }
   0xe   :  { %47 = dma.hbm_to_vmem [thread:$0]  %s1069_s1, 256, %s42_s19, [#allocation6], %s894_s23, %s894_s23, %s895_s24  }
   0xf   :  { %s792_s27 = scalar_lea.vmem %s78_s21, 512  ;;  %p797_p6 = scmp.lt.s32.totalorder %s78_s21, %s78_s21 }
  0x10   :  { %p793_p5 = scmp.ne.s32.totalorder %s78_s21, %s792_s27  ;;  %p798_p7 = scmp.lt.s32.totalorder %s792_s27, %s792_s27 }
  0x12   :  { %p799_p8 = por %p798_p7, %p797_p6 }
  0x14   :  { %p800_p9 = pnand %p799_p8, %p793_p5 }
  0x16   :  { %803 = shalt.err (!%p800_p9)
}
  0x17   :  { %83 = dma.hbm_to_vmem [thread:$0]  %s1077_s9, 512, %s78_s21, [#allocation9], %s894_s23, %s894_s23, %s895_s24  }
  0x18   :  { %s896_s30 = smov [#allocation2]   ;;  %s897_s17 = smov [#allocation7]  }
  0x19   :  { %s29_s16 = sshll.u32 %s896_s30, 4  ;;  %s59_s18 = sshll.u32 %s897_s17, 4  ;;  %s30_s16 = int_to_ptr.vmem [resolvable:$true] %s29_s16  ;;  %s60_s18 = int_to_ptr.vmem [resolvable:$true] %s59_s18 }
  0x1a   :  { %s812_s1 = scalar_lea.vmem %s30_s16, 256  ;;  %p817_p11 = scmp.lt.s32.totalorder %s30_s16, %s30_s16 }
  0x1b   :  { %p813_p10 = scmp.ne.s32.totalorder %s30_s16, %s812_s1  ;;  %p818_p12 = scmp.lt.s32.totalorder %s812_s1, %s812_s1 }
  0x1d   :  { %p819_p13 = por %p818_p12, %p817_p11 }
  0x1f   :  { %p820_p0 = pnand %p819_p13, %p813_p10 }
  0x21   :  { %823 = shalt.err (!%p820_p0)
}
  0x22   :  { %35 = dma.hbm_to_vmem [thread:$0]  %s1068_s0, 256, %s30_s16, [#allocation3], %s894_s23, %s894_s23, %s895_s24  }
  0x23   :  { %s832_s9 = scalar_lea.vmem %s60_s18, 512  ;;  %p837_p2 = scmp.lt.s32.totalorder %s60_s18, %s60_s18 }
  0x24   :  { %p833_p1 = scmp.ne.s32.totalorder %s60_s18, %s832_s9  ;;  %p838_p3 = scmp.lt.s32.totalorder %s832_s9, %s832_s9 }
  0x26   :  { %p839_p4 = por %p838_p3, %p837_p2 }
  0x28   :  { %p840_p5 = pnand %p839_p4, %p833_p1 }
  0x2a   :  { %843 = shalt.err (!%p840_p5)
}
  0x2b   :  { %65 = dma.hbm_to_vmem [thread:$0]  %s1073_s5, 512, %s60_s18, [#allocation6], %s894_s23, %s894_s23, %s895_s24  }
  0x2c   :  { %s898_s25 = smov [#allocation10]  }
  0x2d   :  { %s95_s26 = sshll.u32 %s898_s25, 4  ;;  %s96_s26 = int_to_ptr.vmem [resolvable:$true] %s95_s26 }
  0x2e   :  { %s852_s27 = scalar_lea.vmem %s96_s26, 512  ;;  %p857_p7 = scmp.lt.s32.totalorder %s96_s26, %s96_s26 }
  0x2f   :  { %p853_p6 = scmp.ne.s32.totalorder %s96_s26, %s852_s27  ;;  %p858_p8 = scmp.lt.s32.totalorder %s852_s27, %s852_s27 }
  0x31   :  { %p859_p9 = por %p858_p8, %p857_p7 }
  0x33   :  { %p860_p10 = pnand %p859_p9, %p853_p6 }
  0x35   :  { %863 = shalt.err (!%p860_p10)
}
  0x36   :  { %101 = dma.hbm_to_vmem [thread:$0]  %s1081_s13, 512, %s96_s26, [#allocation9], %s894_s23, %s894_s23, %s895_s24  }
  0x37   :  { %884 = dma.done.wait [#allocation3], 256  }
  0x38   :  { %885 = vsyncadd [#allocation3], 4294967040 }
  0x39   :  { %886 = dma.done.wait [#allocation6], 768  }
  0x3a   :  { %887 = vsyncadd [#allocation6], 4294966528 }
  0x3b   :  { %888 = dma.done.wait [#allocation9], 1024  }
  0x3c   :  { %889 = vsyncadd [#allocation9], 4294966272  ;;  %vm130_vm0 = vcmask 130048   ;;  %v122_v0 = vld [vmem:[#allocation5 + $0x8] sm:$0xff]  ;;  %v121_v1 = vld [vmem:[#allocation5] sm:$0xff]  ;;  %vm214_vm1 = vcmask 261120  }
  0x3d   :  { %v119_v2 = vld [vmem:[#allocation2] sm:$0xff]  ;;  %704 = vmatprep.subr.mxu0 %v122_v0  ;;  %v120_v3 = vld [vmem:[#allocation2 + $0x8] sm:$0xff]  ;;  %v266_v21 = vld [vmem:[#allocation7 + $0x18] sm:$0xff] }
  0x3e   :  { %708 = vmatprep.mubr.msk.f32.mxu0 %vm130_vm0, %v119_v2  ;;  %705 = vmatpush3.msra.mxu0 %v122_v0  ;;  %v664_v5 = vld [vmem:[%s1070_s2] ss:$0 sm:$0xff]  ;;  %v265_v22 = vld [vmem:[#allocation7 + $0x10] sm:$0xff]  ;;  %v264_v23 = vld [vmem:[#allocation7 + $0x8] sm:$0xff] }
  0x3f   :  { %706 = vmatprep.subr.mxu0 %v121_v1  ;;  %711 = vmatprep.subr.mxu1 %v266_v21  ;;  %v263_v24 = vld [vmem:[#allocation7] sm:$0xff]  ;;  %v410_v62 = vld [vmem:[#allocation8 + $0x18] sm:$0xff]  ;;  %v409_v63 = vld [vmem:[#allocation8 + $0x10] sm:$0xff] }
  0x40   :  { %707 = vmatpush3.msra.mxu0 %v121_v1  ;;  %712 = vmatpush3.msra.mxu1 %v266_v21  ;;  %v667_v32 = vld [vmem:[%s1071_s3] ss:$0 sm:$0xff]  ;;  %v408_v0 = vld [vmem:[#allocation8 + $0x8] sm:$0xff] }
  0x41   :  { %709 = vmatmul.mubr.msk.f32.vlgmr.msra.gmra.mxu0 %vm130_vm0, %v120_v3  ;;  %713 = vmatprep.subr.mxu1 %v265_v22  ;;  %v668_v34 = vld [vmem:[%s1072_s4] ss:$0 sm:$0xff] }
  0x42   :  { %714 = vmatpush3.msra.mxu1 %v265_v22  ;;  %v669_v45 = vld [vmem:[%s1074_s6] ss:$0 sm:$0xff]  ;;  %722 = vmatprep.subr.mxu0 %v410_v62 }
  0x43   :  { %715 = vmatprep.subr.mxu1 %v264_v23  ;;  %723 = vmatpush3.msra.mxu0 %v410_v62  ;;  %v407_v1 = vld [vmem:[#allocation8] sm:$0xff] }
  0x44   :  { %716 = vmatpush3.msra.mxu1 %v264_v23  ;;  %724 = vmatprep.subr.mxu0 %v409_v63 }
  0x45   :  { %717 = vmatprep.subr.mxu1 %v263_v24  ;;  %725 = vmatpush3.msra.mxu0 %v409_v63 }
  0x46   :  { %718 = vmatpush3.msra.mxu1 %v263_v24  ;;  %726 = vmatprep.subr.mxu0 %v408_v0  ;;  %v674_v24 = vld [vmem:[%s1078_s10] ss:$0 sm:$0xff] }
  0x47   :  { %727 = vmatpush3.msra.mxu0 %v408_v0 }
  0x48   :  { %728 = vmatprep.subr.mxu0 %v407_v1 }
  0x49   :  { %729 = vmatpush3.msra.mxu0 %v407_v1 }
 0x101   :  { %v710_v4 = vpop.f32.mrf.mxu0 }
 0x102   :  { %v209_v8 = vadd.f32 %v710_v4, %v664_v5 }
 0x103   :  { %v203_v6 = vpop.f32.mrf.mxu0 }
 0x104   :  { %v204_v7 = vadd.f32 %v664_v5, %v203_v6  ;;  %v218_v10 = vsel %vm214_vm1, %v209_v8, 0.0 }
 0x106   :  { %v215_v9 = vsel %vm214_vm1, %v204_v7, 0.0 }
 0x107   :  { %216 = vadd.xlane.f32.xlu0 %v215_v9  ;;  %v672_v9 = vld [vmem:[%s1075_s7] ss:$0 sm:$0xff] }
 0x10b   :  { %219 = vadd.xlane.f32.xlu0 %v218_v10 }
 0x190   :  { %v217_v11 = vpop.xlane.xlu0 %216 }
 0x191   :  { %v221_v12 = vmul.f32 0.03125, %v217_v11 }
 0x193   :  { %v223_v13 = vsub.f32 %v204_v7, %v221_v12  ;;  %v673_v12 = vld [vmem:[%s1076_s8] ss:$0 sm:$0xff] }
 0x194   :  { %v220_v14 = vpop.xlane.xlu0 %219 }
 0x195   :  { %v222_v15 = vmul.f32 0.03125, %v220_v14  ;;  %v225_v16 = vmul.f32 %v223_v13, %v223_v13 }
 0x197   :  { %v224_v17 = vsub.f32 %v209_v8, %v222_v15  ;;  %v227_v18 = vsel %vm214_vm1, %v225_v16, 0.0 }
 0x198   :  { %228 = vadd.xlane.f32.xlu1 %v227_v18 }
 0x199   :  { %v226_v19 = vmul.f32 %v224_v17, %v224_v17 }
 0x19b   :  { %v230_v20 = vsel %vm214_vm1, %v226_v19, 0.0 }
 0x19c   :  { %231 = vadd.xlane.f32.xlu1 %v230_v20 }
 0x221   :  { %v229_v25 = vpop.xlane.xlu1 %228 }
 0x222   :  { %v233_v26 = vmul.f32 0.03125, %v229_v25 }
 0x224   :  { %v235_v27 = vadd.f32 1e-05, %v233_v26 }
 0x225   :  { %v232_v28 = vpop.xlane.xlu1 %231 }
 0x226   :  { %752 = vrsqrt.f32 %v235_v27  ;;  %v234_v29 = vmul.f32 0.03125, %v232_v28 }
 0x228   :  { %v236_v30 = vadd.f32 1e-05, %v234_v29 }
 0x22a   :  { %754 = vrsqrt.f32 %v236_v30 }
 0x233   :  { %v753_v31 = vpop.eup %752 }
 0x234   :  { %v239_v33 = vmul.f32 %v753_v31, %v223_v13 }
 0x236   :  { %v247_v35 = vmul.f32 %v667_v32, %v239_v33 }
 0x237   :  { %v755_v36 = vpop.eup %754 }
 0x238   :  { %v240_v37 = vmul.f32 %v755_v36, %v224_v17  ;;  %v255_v38 = vadd.f32 %v668_v34, %v247_v35 }
 0x23a   :  { %v248_v39 = vmul.f32 %v667_v32, %v240_v37  ;;  %vm257_vm2 = vcmp.ge.f32.partialorder %v255_v38, 0.0  ;;  %v259_v40 = vmul.f32 0.01, %v255_v38 }
 0x23c   :  { %v256_v41 = vadd.f32 %v668_v34, %v248_v39  ;;  %v1023_v42 = vsel %vm257_vm2, %v255_v38, %v259_v40 }
 0x23d   :  { %719 = vmatprep.mubr.msk.f32.mxu1 %vm214_vm1, %v1023_v42 }
 0x23e   :  { %vm258_vm3 = vcmp.ge.f32.partialorder %v256_v41, 0.0  ;;  %v260_v43 = vmul.f32 0.01, %v256_v41 }
 0x240   :  { %v262_v44 = vsel %vm258_vm3, %v256_v41, %v260_v43  ;;  %v554_v41 = vld [vmem:[#allocation10 + $0x18] sm:$0xff]  ;;  %v552_v43 = vld [vmem:[#allocation10 + $0x8] sm:$0xff] }
 0x241   :  { %720 = vmatmul.mubr.msk.f32.vlgmr.msra.gmra.mxu1 %vm214_vm1, %v262_v44  ;;  %733 = vmatprep.subr.mxu1 %v554_v41 }
 0x242   :  { %734 = vmatpush3.msra.mxu1 %v554_v41 }
 0x301   :  { %v721_v46 = vpop.f32.mrf.mxu1 }
 0x302   :  { %v352_v47 = vadd.f32 %v721_v46, %v669_v45 }
 0x303   :  { %v346_v48 = vpop.f32.mrf.mxu1 }
 0x304   :  { %v347_v49 = vadd.f32 %v669_v45, %v346_v48  ;;  %v360_v50 = vsel %vm214_vm1, %v352_v47, 0.0 }
 0x305   :  { %361 = vadd.xlane.f32.xlu1 %v360_v50 }
 0x306   :  { %v357_v51 = vsel %vm214_vm1, %v347_v49, 0.0 }
 0x307   :  { %358 = vadd.xlane.f32.xlu0 %v357_v51 }
 0x38e   :  { %v362_v52 = vpop.xlane.xlu1 %361 }
 0x38f   :  { %v364_v53 = vmul.f32 0.03125, %v362_v52  ;;  %v677_v52 = vld [vmem:[%s1079_s11] ss:$0 sm:$0xff] }
 0x390   :  { %v359_v54 = vpop.xlane.xlu0 %358 }
 0x391   :  { %v366_v55 = vsub.f32 %v352_v47, %v364_v53  ;;  %v363_v56 = vmul.f32 0.03125, %v359_v54 }
 0x393   :  { %v365_v57 = vsub.f32 %v347_v49, %v363_v56  ;;  %v368_v58 = vmul.f32 %v366_v55, %v366_v55 }
 0x395   :  { %v372_v59 = vsel %vm214_vm1, %v368_v58, 0.0  ;;  %v367_v60 = vmul.f32 %v365_v57, %v365_v57 }
 0x396   :  { %373 = vadd.xlane.f32.xlu1 %v372_v59 }
 0x397   :  { %v369_v61 = vsel %vm214_vm1, %v367_v60, 0.0 }
 0x398   :  { %370 = vadd.xlane.f32.xlu0 %v369_v61 }
 0x41f   :  { %v374_v2 = vpop.xlane.xlu1 %373 }
 0x420   :  { %v376_v3 = vmul.f32 0.03125, %v374_v2 }
 0x421   :  { %v371_v4 = vpop.xlane.xlu0 %370 }
 0x422   :  { %v378_v5 = vadd.f32 1e-05, %v376_v3  ;;  %v375_v6 = vmul.f32 0.03125, %v371_v4  ;;  %v679_v3 = vld [vmem:[%s1082_s14] ss:$0 sm:$0xff] }
 0x424   :  { %756 = vrsqrt.f32 %v378_v5  ;;  %v377_v7 = vadd.f32 1e-05, %v375_v6 }
 0x426   :  { %758 = vrsqrt.f32 %v377_v7 }
 0x431   :  { %v757_v8 = vpop.eup %756 }
 0x432   :  { %v382_v10 = vmul.f32 %v757_v8, %v366_v55  ;;  %v678_v55 = vld [vmem:[%s1080_s12] ss:$0 sm:$0xff]  ;;  %s899_s12 = smov [#allocation11]  }
 0x433   :  { %v759_v11 = vpop.eup %758  ;;  %s650_s22 = sshll.u32 %s899_s12, 4  ;;  %s651_s22 = int_to_ptr.vmem [resolvable:$true] %s650_s22 }
 0x434   :  { %v381_v13 = vmul.f32 %v759_v11, %v365_v57  ;;  %v390_v14 = vmul.f32 %v672_v9, %v382_v10  ;;  %s864_s25 = scalar_lea.vmem %s651_s22, 256  ;;  %p869_p12 = scmp.lt.s32.totalorder %s651_s22, %s651_s22 }
 0x435   :  { %p865_p11 = scmp.ne.s32.totalorder %s651_s22, %s864_s25  ;;  %p870_p13 = scmp.lt.s32.totalorder %s864_s25, %s864_s25 }
 0x436   :  { %v389_v15 = vmul.f32 %v672_v9, %v381_v13  ;;  %v398_v16 = vadd.f32 %v673_v12, %v390_v14 }
 0x437   :  { %p871_p0 = por %p870_p13, %p869_p12 }
 0x438   :  { %v397_v17 = vadd.f32 %v673_v12, %v389_v15  ;;  %vm400_vm4 = vcmp.ge.f32.partialorder %v398_v16, 0.0  ;;  %v402_v18 = vmul.f32 0.01, %v398_v16 }
 0x439   :  { %p872_p1 = pnand %p871_p0, %p865_p11 }
 0x43a   :  { %vm399_vm5 = vcmp.ge.f32.partialorder %v397_v17, 0.0  ;;  %v401_v19 = vmul.f32 0.01, %v397_v17  ;;  %v404_v20 = vsel %vm400_vm4, %v398_v16, %v402_v18 }
 0x43b   :  { %v406_v23 = vadd.f32 %v404_v20, %v262_v44  ;;  %v551_v44 = vld [vmem:[#allocation10] sm:$0xff] }
 0x43c   :  { %v403_v21 = vsel %vm399_vm5, %v397_v17, %v401_v19 }
 0x43d   :  { %v405_v22 = vadd.f32 %v403_v21, %v1023_v42  ;;  %v553_v42 = vld [vmem:[#allocation10 + $0x10] sm:$0xff] }
 0x43e   :  { %735 = vmatprep.subr.mxu1 %v553_v42 }
 0x43f   :  { %730 = vmatprep.mubr.msk.f32.mxu0 %vm214_vm1, %v405_v22  ;;  %736 = vmatpush3.msra.mxu1 %v553_v42 }
 0x440   :  { %731 = vmatmul.mubr.msk.f32.vlgmr.msra.gmra.mxu0 %vm214_vm1, %v406_v23  ;;  %737 = vmatprep.subr.mxu1 %v552_v43 }
 0x441   :  { %738 = vmatpush3.msra.mxu1 %v552_v43 }
 0x442   :  { %739 = vmatprep.subr.mxu1 %v551_v44 }
 0x443   :  { %740 = vmatpush3.msra.mxu1 %v551_v44 }
 0x500   :  { %v732_v25 = vpop.f32.mrf.mxu0 }
 0x501   :  { %v496_v26 = vadd.f32 %v732_v25, %v674_v24 }
 0x502   :  { %v490_v27 = vpop.f32.mrf.mxu0 }
 0x503   :  { %v491_v28 = vadd.f32 %v674_v24, %v490_v27  ;;  %v504_v29 = vsel %vm214_vm1, %v496_v26, 0.0 }
 0x504   :  { %505 = vadd.xlane.f32.xlu1 %v504_v29 }
 0x505   :  { %v501_v30 = vsel %vm214_vm1, %v491_v28, 0.0 }
 0x506   :  { %502 = vadd.xlane.f32.xlu0 %v501_v30 }
 0x58d   :  { %v506_v31 = vpop.xlane.xlu1 %505 }
 0x58e   :  { %v508_v32 = vmul.f32 0.03125, %v506_v31 }
 0x58f   :  { %v503_v33 = vpop.xlane.xlu0 %502 }
 0x590   :  { %v510_v34 = vsub.f32 %v496_v26, %v508_v32  ;;  %v507_v35 = vmul.f32 0.03125, %v503_v33 }
 0x592   :  { %v509_v36 = vsub.f32 %v491_v28, %v507_v35  ;;  %v512_v37 = vmul.f32 %v510_v34, %v510_v34 }
 0x594   :  { %v516_v38 = vsel %vm214_vm1, %v512_v37, 0.0  ;;  %v511_v39 = vmul.f32 %v509_v36, %v509_v36 }
 0x595   :  { %517 = vadd.xlane.f32.xlu1 %v516_v38 }
 0x596   :  { %v513_v40 = vsel %vm214_vm1, %v511_v39, 0.0 }
 0x597   :  { %514 = vadd.xlane.f32.xlu0 %v513_v40 }
 0x61e   :  { %v518_v45 = vpop.xlane.xlu1 %517 }
 0x61f   :  { %v520_v46 = vmul.f32 0.03125, %v518_v45 }
 0x620   :  { %v515_v47 = vpop.xlane.xlu0 %514 }
 0x621   :  { %v522_v48 = vadd.f32 1e-05, %v520_v46  ;;  %v519_v49 = vmul.f32 0.03125, %v515_v47 }
 0x623   :  { %760 = vrsqrt.f32 %v522_v48  ;;  %v521_v50 = vadd.f32 1e-05, %v519_v49 }
 0x625   :  { %762 = vrsqrt.f32 %v521_v50 }
 0x630   :  { %v761_v51 = vpop.eup %760 }
 0x631   :  { %v526_v53 = vmul.f32 %v761_v51, %v510_v34 }
 0x632   :  { %v763_v54 = vpop.eup %762 }
 0x633   :  { %v525_v56 = vmul.f32 %v763_v54, %v509_v36  ;;  %v534_v57 = vmul.f32 %v677_v52, %v526_v53 }
 0x635   :  { %v533_v58 = vmul.f32 %v677_v52, %v525_v56  ;;  %v542_v59 = vadd.f32 %v678_v55, %v534_v57 }
 0x637   :  { %v541_v60 = vadd.f32 %v678_v55, %v533_v58  ;;  %vm544_vm6 = vcmp.ge.f32.partialorder %v542_v59, 0.0  ;;  %v546_v61 = vmul.f32 0.01, %v542_v59 }
 0x639   :  { %vm543_vm7 = vcmp.ge.f32.partialorder %v541_v60, 0.0  ;;  %v545_v62 = vmul.f32 0.01, %v541_v60  ;;  %v548_v63 = vsel %vm544_vm6, %v542_v59, %v546_v61 }
 0x63a   :  { %v550_v2 = vadd.f32 %v548_v63, %v406_v23 }
 0x63b   :  { %v547_v0 = vsel %vm543_vm7, %v541_v60, %v545_v62 }
 0x63c   :  { %v549_v1 = vadd.f32 %v547_v0, %v405_v22 }
 0x63e   :  { %741 = vmatprep.mubr.msk.f32.mxu1 %vm214_vm1, %v549_v1 }
 0x63f   :  { %742 = vmatmul.mubr.msk.f32.vlgmr.msra.gmra.mxu1 %vm214_vm1, %v550_v2 }
 0x6ff   :  { %v743_v4 = vpop.f32.mrf.mxu1 }
 0x700   :  { %v640_v5 = vadd.f32 %v743_v4, %v679_v3 }
 0x701   :  { %v634_v6 = vpop.f32.mrf.mxu1 }
 0x702   :  { %644 = vst [vmem:[#allocation11 + $0x8] sm:$0xff] %v640_v5  ;;  %v635_v7 = vadd.f32 %v679_v3, %v634_v6 }
 0x704   :  { %643 = vst [vmem:[#allocation11] sm:$0xff] %v635_v7 }
 0x705   :  { %875 = shalt.err (!%p872_p1)
}
 0x706   :  { %656 = dma.vmem_to_hbm [thread:$0]  %s651_s22, 256, %s1083_s15, [#allocation4], %s894_s23, %s894_s23, %s895_s24  }
 0x707   :  { %890 = dma.done.wait [#allocation4], 256  }
 0x708   :  { %891 = vsyncadd [#allocation4], 4294967040 }
 0x709   :  { %660 = vsyncpa [#allocation3], 1 }
 0x70a   :  { %661 = vsyncpa [#allocation6], 1 }
 0x70b   :  { %662 = vsyncpa [#allocation9], 1 }
 0x70c   :  { %663 = vsyncpa [#allocation4], 1 }

</bundles_post_ra>
